<compile_context>
chip_gen: v7x
topology: tpu7x:2x2x1
jax: 0.10.0
libtpu: 0.0.40
codegen_flags: <defaults>
</compile_context>

<pallas_src>
import jax
import jax.numpy as jnp
from jax.experimental import pallas as pl
from jax.experimental.pallas import tpu as pltpu


def bottleneck_kernel(x_ref, xup_ref, xdn_ref,
                      w1_ref, w2_ref, w3_ref,
                      b1_ref, b2_ref, b3_ref,
                      out_ref):
    # x_ref:   (1, TH, W, Cin)  rows of the image owned by this grid step (bf16)
    # xup_ref: (1, 1, W, Cin)   halo row just above the block (clamped at the
    # xdn_ref: (1, 1, W, Cin)   image border; zeroed after conv1 below) (bf16)
    # w2_ref:  (3, 3P, P)       per-row-offset fused 3x3 weights (bf16)
    TH, W, Cin = x_ref.shape[1], x_ref.shape[2], x_ref.shape[3]
    P = w1_ref.shape[1]
    Cout = w3_ref.shape[1]
    HWm = TH * W
    base = 2 * W

    i = pl.program_id(1)
    last = pl.num_programs(1) - 1

    x_main = x_ref[...].reshape(HWm, Cin)          # pixels-as-rows, bf16
    x_up = xup_ref[...].reshape(W, Cin)
    x_dn = xdn_ref[...].reshape(W, Cin)

    # ---- conv1 (1x1, BN scale folded into w1) + bias + relu ----------------
    # One fused matmul over [halo-up | main | halo-dn]; result goes to bf16
    # right after the bias+ReLU (everything downstream stays bf16 until the
    # f32 MXU accumulators).
    xcat = jnp.concatenate([x_up, x_main, x_dn], axis=0)        # (HWm+2W, Cin)
    t1f = jnp.dot(xcat, w1_ref[...], preferred_element_type=jnp.float32)
    t1f = jnp.maximum(t1f + b1_ref[...], 0.0)
    t1 = t1f.astype(jnp.bfloat16)                               # (HWm+2W, P)

    # Zero the halo rows at the image top/bottom (conv2's zero padding must be
    # zero in t1-space, not x-space): a single (rows,1) bf16 broadcast multiply.
    rows = jax.lax.broadcasted_iota(jnp.int32, (HWm + 2 * W, 1), 0)
    keep = jnp.logical_and(jnp.logical_or(rows >= W, i > 0),
                           jnp.logical_or(rows < HWm + W, i < last))
    t1 = t1 * keep.astype(jnp.bfloat16)

    # Row-flattened zero-padded view (bf16):
    #   [0,W) zeros | [W,2W) halo-up | [2W,2W+HWm) main | halo-dn | zeros
    zpad = jnp.zeros((W, P), jnp.bfloat16)
    A = jnp.concatenate([zpad, t1, zpad], axis=0)               # (HWm+4W, P)

    # Column-border masks, applied ONCE to the whole padded buffer (valid for
    # every row offset because all regions are W-aligned):
    #   A_L[m] feeds ox=-1 taps -> invalid when (m % W) == W-1 (output col 0)
    #   A_R[m] feeds ox=+1 taps -> invalid when (m % W) == 0   (output col W-1)
    col = jax.lax.broadcasted_iota(jnp.int32, (HWm + 4 * W, 1), 0) % W
    A_L = A * (col != W - 1).astype(jnp.bfloat16)
    A_R = A * (col != 0).astype(jnp.bfloat16)

    # ---- conv2 (3x3, stride 1, pad 1, BN scale folded) + bias + relu -------
    # Three MXU calls, each contracting K = 3P (the three horizontal taps
    # concatenated along channels), instead of nine K = P dots.
    acc = None
    for t, oy in enumerate((-1, 0, 1)):
        s = base + oy * W
        patch = jnp.concatenate(
            [A_L[s - 1:s - 1 + HWm, :],
             A[s:s + HWm, :],
             A_R[s + 1:s + 1 + HWm, :]], axis=1)                # (HWm, 3P) bf16
        d = jnp.dot(patch, w2_ref[t], preferred_element_type=jnp.float32)
        acc = d if acc is None else acc + d
    t2 = jnp.maximum(acc + b2_ref[...], 0.0).astype(jnp.bfloat16)   # (HWm, P)

    # ---- conv3 (1x1, BN scale folded) + bias, identity residual, relu ------
    t3 = jnp.dot(t2, w3_ref[...], preferred_element_type=jnp.float32)
    t3 = t3 + b3_ref[...]
    out = jnp.maximum(t3 + x_main.astype(jnp.float32), 0.0)     # (HWm, Cout)
    out_ref[0] = out.reshape(TH, W, Cout).astype(out_ref.dtype)


def _vmem_capacity_bytes():
    try:
        return int(pltpu.get_tpu_info().vmem_capacity_bytes)
    except Exception:
        return 128 << 20


def _pick_row_block(N, H, W, Cin, P, Cout, cap):
    """VMEM-budget-driven row tile: as large as fits, keeping >=2 row blocks
    when N is small so the v7x megacore has work on both TensorCores."""
    # Activation/transient budget per grid step; leave headroom for Mosaic
    # internal scratch and the double-buffered weight operands.
    budget = (22 << 20) if cap <= (64 << 20) else (48 << 20)
    wbytes = 2 * 2 * (Cin * P + 9 * P * P + P * Cout)     # 2x-buffered bf16
    budget = max(budget - wbytes, 2 << 20)
    # Rough per-pixel bytes: bf16 I/O blocks (2x-buffered), bf16 padded conv1
    # window (x3 for the masked copies), f32 conv2 accumulator, bf16 patches,
    # f32 conv3 output.
    per_px = 6 * Cin + 26 * P + 10 * Cout
    divs = [d for d in range(1, H + 1) if H % d == 0]
    fit = [d for d in divs if d * W * per_px <= budget]
    if not fit:
        return 1
    min_blocks = 2 if (N < 2 and H >= 2) else 1
    pref = [d for d in fit if H // d >= min_blocks]
    return max(pref) if pref else max(fit)


def bottleneck_pallas(x_nhwc, w1, w2, w3, s1, b1, s2, b2, s3, b3,
                      row_block=None):
    N, H, W, Cin = x_nhwc.shape
    P = w1.shape[1]
    Cout = w3.shape[1]
    assert Cin == Cout, "identity residual requires inplanes == planes*expansion"
    assert W >= 2 and W % 8 == 0, "W must be a multiple of 8"

    cap = _vmem_capacity_bytes()
    if row_block is None:
        row_block = _pick_row_block(N, H, W, Cin, P, Cout, cap)
    TH = int(row_block)
    assert H % TH == 0

    # Fold BN scale into the conv weights in f32, then cast to bf16; only the
    # bias adds remain in-kernel.  The 3x3 weights are pre-reshaped to
    # (3, 3P, P) so each row offset is a single K=3P matmul in the kernel.
    w1f = (w1 * s1.reshape(1, -1)).astype(jnp.bfloat16)
    w2s = (w2 * s2.reshape(1, 1, -1)).astype(jnp.float32)        # (9, P, P)
    w2r = w2s.reshape(3, 3, P, P).reshape(3, 3 * P, P).astype(jnp.bfloat16)
    w3f = (w3 * s3.reshape(1, -1)).astype(jnp.bfloat16)
    b1f = b1.reshape(1, -1).astype(jnp.float32)
    b2f = b2.reshape(1, -1).astype(jnp.float32)
    b3f = b3.reshape(1, -1).astype(jnp.float32)
    xb = x_nhwc.astype(jnp.bfloat16)   # bf16 skip path (intentional quantization)

    # Generation-aware scoped-VMEM limit: ~48 MiB on 64 MiB v7x parts,
    # ~96 MiB on 128 MiB v5e/v6e parts.
    vmem_limit = min((cap * 3) // 4, 100 << 20)
    if vmem_limit < (32 << 20):
        vmem_limit = None

    grid = (N, H // TH)
    return pl.pallas_call(
        bottleneck_kernel,
        out_shape=jax.ShapeDtypeStruct((N, H, W, Cout), jnp.bfloat16),
        grid_spec=pltpu.PrefetchScalarGridSpec(
            num_scalar_prefetch=0,
            grid=grid,
            in_specs=[
                # main rows of the image for this step
                pl.BlockSpec((1, TH, W, Cin), lambda n, i: (n, i, 0, 0)),
                # single halo row above / below (clamped at the image border,
                # zeroed after conv1 inside the kernel)
                pl.BlockSpec((1, 1, W, Cin),
                             lambda n, i: (n, jnp.maximum(i * TH - 1, 0), 0, 0)),
                pl.BlockSpec((1, 1, W, Cin),
                             lambda n, i: (n, jnp.minimum(i * TH + TH, H - 1), 0, 0)),
                pl.BlockSpec((Cin, P), lambda n, i: (0, 0)),
                pl.BlockSpec((3, 3 * P, P), lambda n, i: (0, 0, 0)),
                pl.BlockSpec((P, Cout), lambda n, i: (0, 0)),
                pl.BlockSpec((1, P), lambda n, i: (0, 0)),
                pl.BlockSpec((1, P), lambda n, i: (0, 0)),
                pl.BlockSpec((1, Cout), lambda n, i: (0, 0)),
            ],
            out_specs=pl.BlockSpec((1, TH, W, Cout), lambda n, i: (n, i, 0, 0)),
        ),
        compiler_params=pltpu.CompilerParams(
            dimension_semantics=("parallel", "parallel"),
            vmem_limit_bytes=vmem_limit),
    )(xb, xb, xb, w1f, w2r, w3f, b1f, b2f, b3f)


def bottleneck_reference(x_nhwc, w1, w2, w3, s1, b1, s2, b2, s3, b3):
    """Plain-JAX f32 reference (same eval-mode BN semantics)."""
    P = w1.shape[1]
    t1 = jnp.einsum('nhwc,cp->nhwp', x_nhwc, w1) * s1[0] + b1[0]
    t1 = jnp.maximum(t1, 0.0)
    w2_hwio = w2.reshape(3, 3, P, P)
    t2 = jax.lax.conv_general_dilated(
        t1, w2_hwio, window_strides=(1, 1), padding=((1, 1), (1, 1)),
        dimension_numbers=('NHWC', 'HWIO', 'NHWC'))
    t2 = jnp.maximum(t2 * s2[0] + b2[0], 0.0)
    t3 = jnp.einsum('nhwp,pc->nhwc', t2, w3) * s3[0] + b3[0]
    return jnp.maximum(t3 + x_nhwc, 0.0)


def fold_bn(gamma, beta, mean, var, eps=1e-5):
    scale = gamma / jnp.sqrt(var + eps)
    bias = beta - mean * scale
    return scale.reshape(1, -1), bias.reshape(1, -1)


if __name__ == "__main__":
    # inplanes = planes * expansion so the identity residual is
    # shape-compatible (PyTorch module with downsample=None, stride=1).
    # Channels = 128 keeps the input/output lane-dense (no masked partial
    # stores) while the overall problem stays small.
    N, H, W = 2, 16, 16
    planes = 32
    expansion = 4
    inplanes = planes * expansion      # 128
    cout = planes * expansion          # 128

    key = jax.random.PRNGKey(0)
    ks = jax.random.split(key, 16)

    # Input in PyTorch NCHW, converted to NHWC for the kernel.
    x_nchw = jax.random.normal(ks[0], (N, inplanes, H, W), jnp.float32)
    x_nhwc = jnp.transpose(x_nchw, (0, 2, 3, 1))

    # Conv weights (deterministic, synthetic).
    w1 = jax.random.normal(ks[1], (inplanes, planes), jnp.float32) * 0.1
    w2 = jax.random.normal(ks[2], (9, planes, planes), jnp.float32) * 0.1
    w3 = jax.random.normal(ks[3], (planes, cout), jnp.float32) * 0.1

    # BatchNorm params (gamma, beta, running mean/var), folded to scale/bias.
    def bn_params(kg, kb, km, kv, c):
        gamma = 1.0 + 0.1 * jax.random.normal(kg, (c,), jnp.float32)
        beta = 0.1 * jax.random.normal(kb, (c,), jnp.float32)
        mean = 0.1 * jax.random.normal(km, (c,), jnp.float32)
        var = 1.0 + 0.1 * jax.random.uniform(kv, (c,), jnp.float32)
        return fold_bn(gamma, beta, mean, var)

    s1, b1 = bn_params(ks[4], ks[5], ks[6], ks[7], planes)
    s2, b2 = bn_params(ks[8], ks[9], ks[10], ks[11], planes)
    s3, b3 = bn_params(ks[12], ks[13], ks[14], ks[15], cout)

    # row_block=8 -> 2 spatial blocks per image: exercises the halo path.
    out = bottleneck_pallas(x_nhwc, w1, w2, w3, s1, b1, s2, b2, s3, b3,
                            row_block=8)
    out = jax.block_until_ready(out)

    ref = bottleneck_reference(x_nhwc, w1, w2, w3, s1, b1, s2, b2, s3, b3)
    assert out.shape == (N, H, W, cout)
    assert out.dtype == jnp.bfloat16
    out_f32 = out.astype(jnp.float32)
    max_err = jnp.max(jnp.abs(out_f32 - ref))
    # bf16 weights/activations on both MXU inputs and the skip path: loosened
    # tolerance vs the f32 reference (structural bugs show up as O(1) errors).
    assert jnp.allclose(out_f32, ref, atol=1e-1, rtol=5e-2), \
        f"max abs err {max_err}"

    print("KERNEL_OK")
</pallas_src>

<mosaic_0001>
module attributes {stable_mosaic.version = 11 : i64} {
  func.func @bottleneck_kernel(%arg0: i32, %arg1: i32, %arg2: memref<1x8x16x128xbf16, #tpu.memory_space<vmem>>, %arg3: memref<1x1x16x128xbf16, #tpu.memory_space<vmem>>, %arg4: memref<1x1x16x128xbf16, #tpu.memory_space<vmem>>, %arg5: memref<128x32xbf16, #tpu.memory_space<vmem>>, %arg6: memref<3x96x32xbf16, #tpu.memory_space<vmem>>, %arg7: memref<32x128xbf16, #tpu.memory_space<vmem>>, %arg8: memref<1x32xf32, #tpu.memory_space<vmem>>, %arg9: memref<1x32xf32, #tpu.memory_space<vmem>>, %arg10: memref<1x128xf32, #tpu.memory_space<vmem>>, %arg11: memref<1x8x16x128xbf16, #tpu.memory_space<vmem>>) attributes {dimension_semantics = [#tpu.dimension_semantics<parallel>, #tpu.dimension_semantics<parallel>], iteration_bounds = array<i64: 2, 2>, scalar_prefetch = 0 : i64, scratch_operands = 0 : i64, tpu.core_type = #tpu.core_type<tc>, window_params = [{transform_indices = @transform_0, window_bounds = array<i64: 1, 8, 16, 128>}, {transform_indices = @transform_1, window_bounds = array<i64: 1, 1, 16, 128>}, {transform_indices = @transform_2, window_bounds = array<i64: 1, 1, 16, 128>}, {pipeline_mode = #tpu.pipeline_mode<synchronous>, transform_indices = @transform_3, window_bounds = array<i64: 128, 32>}, {pipeline_mode = #tpu.pipeline_mode<synchronous>, transform_indices = @transform_4, window_bounds = array<i64: 3, 96, 32>}, {pipeline_mode = #tpu.pipeline_mode<synchronous>, transform_indices = @transform_5, window_bounds = array<i64: 32, 128>}, {pipeline_mode = #tpu.pipeline_mode<synchronous>, transform_indices = @transform_6, window_bounds = array<i64: 1, 32>}, {pipeline_mode = #tpu.pipeline_mode<synchronous>, transform_indices = @transform_7, window_bounds = array<i64: 1, 32>}, {pipeline_mode = #tpu.pipeline_mode<synchronous>, transform_indices = @transform_8, window_bounds = array<i64: 1, 128>}, {transform_indices = @transform_9, window_bounds = array<i64: 1, 8, 16, 128>}]} {
    %c0 = arith.constant 0 : index
    %c0_0 = arith.constant 0 : index
    %c0_1 = arith.constant 0 : index
    %c0_2 = arith.constant 0 : index
    %0 = vector.load %arg2[%c0, %c0_0, %c0_1, %c0_2] : memref<1x8x16x128xbf16, #tpu.memory_space<vmem>>, vector<1x8x16x128xbf16>
    %1 = vector.shape_cast %0 : vector<1x8x16x128xbf16> to vector<128x128xbf16>
    %c0_3 = arith.constant 0 : index
    %c0_4 = arith.constant 0 : index
    %c0_5 = arith.constant 0 : index
    %c0_6 = arith.constant 0 : index
    %2 = vector.load %arg3[%c0_3, %c0_4, %c0_5, %c0_6] : memref<1x1x16x128xbf16, #tpu.memory_space<vmem>>, vector<1x1x16x128xbf16>
    %3 = vector.shape_cast %2 : vector<1x1x16x128xbf16> to vector<16x128xbf16>
    %c0_7 = arith.constant 0 : index
    %c0_8 = arith.constant 0 : index
    %c0_9 = arith.constant 0 : index
    %c0_10 = arith.constant 0 : index
    %4 = vector.load %arg4[%c0_7, %c0_8, %c0_9, %c0_10] : memref<1x1x16x128xbf16, #tpu.memory_space<vmem>>, vector<1x1x16x128xbf16>
    %5 = vector.shape_cast %4 : vector<1x1x16x128xbf16> to vector<16x128xbf16>
    %6 = tpu.concatenate %3, %1, %5 in 0 : vector<16x128xbf16>, vector<128x128xbf16>, vector<16x128xbf16> -> vector<160x128xbf16>
    %c0_11 = arith.constant 0 : index
    %c0_12 = arith.constant 0 : index
    %7 = vector.load %arg5[%c0_11, %c0_12] : memref<128x32xbf16, #tpu.memory_space<vmem>>, vector<128x32xbf16>
    %cst = arith.constant dense<0.000000e+00> : vector<160x32xf32>
    %8 = tpu.matmul %6, %7, %cst {dimension_numbers = #tpu.dot_dimension_numbers<[1], [0], [0], [1], [0, 0, 1, 1], [], []>} : vector<160x128xbf16>, vector<128x32xbf16>, vector<160x32xf32> -> vector<160x32xf32>
    %c0_13 = arith.constant 0 : index
    %c0_14 = arith.constant 0 : index
    %9 = vector.load %arg8[%c0_13, %c0_14] : memref<1x32xf32, #tpu.memory_space<vmem>>, vector<1x32xf32>
    %10 = vector.broadcast %9 : vector<1x32xf32> to vector<160x32xf32>
    %11 = arith.addf %8, %10 : vector<160x32xf32>
    %cst_15 = arith.constant 0.000000e+00 : f32
    %12 = vector.broadcast %cst_15 : f32 to vector<160x32xf32>
    %13 = arith.maximumf %11, %12 : vector<160x32xf32>
    %14 = arith.truncf %13 : vector<160x32xf32> to vector<160x32xbf16>
    %15 = tpu.iota {dimensions = array<i32: 0>} : vector<160x1xi32>
    %c16_i32 = arith.constant 16 : i32
    %16 = vector.broadcast %c16_i32 : i32 to vector<160x1xi32>
    %17 = arith.cmpi sge, %15, %16 : vector<160x1xi32>
    %c0_i32 = arith.constant 0 : i32
    %18 = arith.cmpi sgt, %arg1, %c0_i32 : i32
    %19 = vector.broadcast %18 : i1 to vector<160x1xi1>
    %20 = arith.ori %17, %19 : vector<160x1xi1>
    %c144_i32 = arith.constant 144 : i32
    %21 = vector.broadcast %c144_i32 : i32 to vector<160x1xi32>
    %22 = arith.cmpi slt, %15, %21 : vector<160x1xi32>
    %c1_i32 = arith.constant 1 : i32
    %23 = arith.cmpi slt, %arg1, %c1_i32 : i32
    %24 = vector.broadcast %23 : i1 to vector<160x1xi1>
    %25 = arith.ori %22, %24 : vector<160x1xi1>
    %26 = arith.andi %20, %25 : vector<160x1xi1>
    %27 = arith.extui %26 : vector<160x1xi1> to vector<160x1xi32>
    %28 = arith.sitofp %27 : vector<160x1xi32> to vector<160x1xf32>
    %29 = arith.truncf %28 : vector<160x1xf32> to vector<160x1xbf16>
    %30 = vector.broadcast %29 : vector<160x1xbf16> to vector<160x32xbf16>
    %31 = arith.mulf %14, %30 : vector<160x32xbf16>
    %cst_16 = arith.constant 0.000000e+00 : bf16
    %32 = vector.broadcast %cst_16 : bf16 to vector<16x32xbf16>
    %33 = tpu.concatenate %32, %31, %32 in 0 : vector<16x32xbf16>, vector<160x32xbf16>, vector<16x32xbf16> -> vector<192x32xbf16>
    %34 = tpu.iota {dimensions = array<i32: 0>} : vector<192x1xi32>
    %c16_i32_17 = arith.constant 16 : i32
    %c0_i32_18 = arith.constant 0 : i32
    %35 = arith.cmpi eq, %c16_i32_17, %c0_i32_18 : i32
    %c1_i32_19 = arith.constant 1 : i32
    %36 = arith.select %35, %c1_i32_19, %c16_i32_17 : i32
    %37 = vector.broadcast %36 : i32 to vector<192x1xi32>
    %38 = arith.remsi %34, %37 : vector<192x1xi32>
    %c0_i32_20 = arith.constant 0 : i32
    %39 = vector.broadcast %c0_i32_20 : i32 to vector<192x1xi32>
    %40 = arith.cmpi ne, %38, %39 : vector<192x1xi32>
    %c0_i32_21 = arith.constant 0 : i32
    %41 = vector.broadcast %c0_i32_21 : i32 to vector<192x1xi32>
    %42 = arith.cmpi slt, %38, %41 : vector<192x1xi32>
    %c0_i32_22 = arith.constant 0 : i32
    %43 = arith.cmpi slt, %36, %c0_i32_22 : i32
    %44 = vector.broadcast %43 : i1 to vector<192x1xi1>
    %45 = vector.broadcast %44 : vector<192x1xi1> to vector<192x1xi1>
    %46 = arith.xori %42, %45 : vector<192x1xi1>
    %47 = arith.andi %46, %40 : vector<192x1xi1>
    %48 = vector.broadcast %36 : i32 to vector<192x1xi32>
    %49 = arith.addi %38, %48 : vector<192x1xi32>
    %50 = arith.select %47, %49, %38 : vector<192x1xi1>, vector<192x1xi32>
    %c15_i32 = arith.constant 15 : i32
    %51 = vector.broadcast %c15_i32 : i32 to vector<192x1xi32>
    %52 = arith.cmpi ne, %50, %51 : vector<192x1xi32>
    %53 = arith.extui %52 : vector<192x1xi1> to vector<192x1xi32>
    %54 = arith.sitofp %53 : vector<192x1xi32> to vector<192x1xf32>
    %55 = arith.truncf %54 : vector<192x1xf32> to vector<192x1xbf16>
    %56 = vector.broadcast %55 : vector<192x1xbf16> to vector<192x32xbf16>
    %57 = arith.mulf %33, %56 : vector<192x32xbf16>
    %c0_i32_23 = arith.constant 0 : i32
    %58 = vector.broadcast %c0_i32_23 : i32 to vector<192x1xi32>
    %59 = arith.cmpi ne, %50, %58 : vector<192x1xi32>
    %60 = arith.extui %59 : vector<192x1xi1> to vector<192x1xi32>
    %61 = arith.sitofp %60 : vector<192x1xi32> to vector<192x1xf32>
    %62 = arith.truncf %61 : vector<192x1xf32> to vector<192x1xbf16>
    %63 = vector.broadcast %62 : vector<192x1xbf16> to vector<192x32xbf16>
    %64 = arith.mulf %33, %63 : vector<192x32xbf16>
    %65 = vector.extract_strided_slice %57 {offsets = [15, 0], sizes = [128, 32], strides = [1, 1]} : vector<192x32xbf16> to vector<128x32xbf16>
    %66 = vector.extract_strided_slice %33 {offsets = [16, 0], sizes = [128, 32], strides = [1, 1]} : vector<192x32xbf16> to vector<128x32xbf16>
    %67 = vector.extract_strided_slice %64 {offsets = [17, 0], sizes = [128, 32], strides = [1, 1]} : vector<192x32xbf16> to vector<128x32xbf16>
    %68 = tpu.concatenate %65, %66, %67 in 1 : vector<128x32xbf16>, vector<128x32xbf16>, vector<128x32xbf16> -> vector<128x96xbf16>
    %c0_24 = arith.constant 0 : index
    %c0_25 = arith.constant 0 : index
    %c0_26 = arith.constant 0 : index
    %69 = vector.load %arg6[%c0_24, %c0_25, %c0_26] : memref<3x96x32xbf16, #tpu.memory_space<vmem>>, vector<1x96x32xbf16>
    %70 = vector.shape_cast %69 : vector<1x96x32xbf16> to vector<96x32xbf16>
    %cst_27 = arith.constant dense<0.000000e+00> : vector<128x32xf32>
    %71 = tpu.matmul %68, %70, %cst_27 {dimension_numbers = #tpu.dot_dimension_numbers<[1], [0], [0], [1], [0, 0, 1, 1], [], []>} : vector<128x96xbf16>, vector<96x32xbf16>, vector<128x32xf32> -> vector<128x32xf32>
    %72 = vector.extract_strided_slice %57 {offsets = [31, 0], sizes = [128, 32], strides = [1, 1]} : vector<192x32xbf16> to vector<128x32xbf16>
    %73 = vector.extract_strided_slice %33 {offsets = [32, 0], sizes = [128, 32], strides = [1, 1]} : vector<192x32xbf16> to vector<128x32xbf16>
    %74 = vector.extract_strided_slice %64 {offsets = [33, 0], sizes = [128, 32], strides = [1, 1]} : vector<192x32xbf16> to vector<128x32xbf16>
    %75 = tpu.concatenate %72, %73, %74 in 1 : vector<128x32xbf16>, vector<128x32xbf16>, vector<128x32xbf16> -> vector<128x96xbf16>
    %c1 = arith.constant 1 : index
    %c0_28 = arith.constant 0 : index
    %c0_29 = arith.constant 0 : index
    %76 = vector.load %arg6[%c1, %c0_28, %c0_29] : memref<3x96x32xbf16, #tpu.memory_space<vmem>>, vector<1x96x32xbf16>
    %77 = vector.shape_cast %76 : vector<1x96x32xbf16> to vector<96x32xbf16>
    %cst_30 = arith.constant dense<0.000000e+00> : vector<128x32xf32>
    %78 = tpu.matmul %75, %77, %cst_30 {dimension_numbers = #tpu.dot_dimension_numbers<[1], [0], [0], [1], [0, 0, 1, 1], [], []>} : vector<128x96xbf16>, vector<96x32xbf16>, vector<128x32xf32> -> vector<128x32xf32>
    %79 = arith.addf %71, %78 : vector<128x32xf32>
    %80 = vector.extract_strided_slice %57 {offsets = [47, 0], sizes = [128, 32], strides = [1, 1]} : vector<192x32xbf16> to vector<128x32xbf16>
    %81 = vector.extract_strided_slice %33 {offsets = [48, 0], sizes = [128, 32], strides = [1, 1]} : vector<192x32xbf16> to vector<128x32xbf16>
    %82 = vector.extract_strided_slice %64 {offsets = [49, 0], sizes = [128, 32], strides = [1, 1]} : vector<192x32xbf16> to vector<128x32xbf16>
    %83 = tpu.concatenate %80, %81, %82 in 1 : vector<128x32xbf16>, vector<128x32xbf16>, vector<128x32xbf16> -> vector<128x96xbf16>
    %c2 = arith.constant 2 : index
    %c0_31 = arith.constant 0 : index
    %c0_32 = arith.constant 0 : index
    %84 = vector.load %arg6[%c2, %c0_31, %c0_32] : memref<3x96x32xbf16, #tpu.memory_space<vmem>>, vector<1x96x32xbf16>
    %85 = vector.shape_cast %84 : vector<1x96x32xbf16> to vector<96x32xbf16>
    %cst_33 = arith.constant dense<0.000000e+00> : vector<128x32xf32>
    %86 = tpu.matmul %83, %85, %cst_33 {dimension_numbers = #tpu.dot_dimension_numbers<[1], [0], [0], [1], [0, 0, 1, 1], [], []>} : vector<128x96xbf16>, vector<96x32xbf16>, vector<128x32xf32> -> vector<128x32xf32>
    %87 = arith.addf %79, %86 : vector<128x32xf32>
    %c0_34 = arith.constant 0 : index
    %c0_35 = arith.constant 0 : index
    %88 = vector.load %arg9[%c0_34, %c0_35] : memref<1x32xf32, #tpu.memory_space<vmem>>, vector<1x32xf32>
    %89 = vector.broadcast %88 : vector<1x32xf32> to vector<128x32xf32>
    %90 = arith.addf %87, %89 : vector<128x32xf32>
    %cst_36 = arith.constant 0.000000e+00 : f32
    %91 = vector.broadcast %cst_36 : f32 to vector<128x32xf32>
    %92 = arith.maximumf %90, %91 : vector<128x32xf32>
    %93 = arith.truncf %92 : vector<128x32xf32> to vector<128x32xbf16>
    %c0_37 = arith.constant 0 : index
    %c0_38 = arith.constant 0 : index
    %94 = vector.load %arg7[%c0_37, %c0_38] : memref<32x128xbf16, #tpu.memory_space<vmem>>, vector<32x128xbf16>
    %cst_39 = arith.constant dense<0.000000e+00> : vector<128x128xf32>
    %95 = tpu.matmul %93, %94, %cst_39 {dimension_numbers = #tpu.dot_dimension_numbers<[1], [0], [0], [1], [0, 0, 1, 1], [], []>} : vector<128x32xbf16>, vector<32x128xbf16>, vector<128x128xf32> -> vector<128x128xf32>
    %c0_40 = arith.constant 0 : index
    %c0_41 = arith.constant 0 : index
    %96 = vector.load %arg10[%c0_40, %c0_41] : memref<1x128xf32, #tpu.memory_space<vmem>>, vector<1x128xf32>
    %97 = vector.broadcast %96 : vector<1x128xf32> to vector<128x128xf32>
    %98 = arith.addf %95, %97 : vector<128x128xf32>
    %99 = arith.extf %1 : vector<128x128xbf16> to vector<128x128xf32>
    %100 = arith.addf %98, %99 : vector<128x128xf32>
    %cst_42 = arith.constant 0.000000e+00 : f32
    %101 = vector.broadcast %cst_42 : f32 to vector<128x128xf32>
    %102 = arith.maximumf %100, %101 : vector<128x128xf32>
    %103 = vector.shape_cast %102 : vector<128x128xf32> to vector<8x16x128xf32>
    %104 = arith.truncf %103 : vector<8x16x128xf32> to vector<8x16x128xbf16>
    %c0_43 = arith.constant 0 : index
    %c0_44 = arith.constant 0 : index
    %c0_45 = arith.constant 0 : index
    %c0_46 = arith.constant 0 : index
    %105 = vector.load %arg11[%c0_43, %c0_44, %c0_45, %c0_46] : memref<1x8x16x128xbf16, #tpu.memory_space<vmem>>, vector<1x8x16x128xbf16>
    %106 = vector.shape_cast %105 : vector<1x8x16x128xbf16> to vector<8x16x128xbf16>
    %107 = vector.shape_cast %104 : vector<8x16x128xbf16> to vector<1x8x16x128xbf16>
    tpu.vector_store %arg11[%c0_43, %c0_44, %c0_45, %c0_46], %107 {strides = array<i32>} : memref<1x8x16x128xbf16, #tpu.memory_space<vmem>>, vector<1x8x16x128xbf16>,
    return
  }
  func.func @transform_0(%arg0: i32, %arg1: i32) -> (i32, i32, i32, i32) {
    %c0_i32 = arith.constant 0 : i32
    %c0_i32_0 = arith.constant 0 : i32
    %c0_i32_1 = arith.constant 0 : i32
    return %arg0, %arg1, %c0_i32, %c0_i32_0 : i32, i32, i32, i32
  }
  func.func @transform_1(%arg0: i32, %arg1: i32) -> (i32, i32, i32, i32) {
    %c8_i32 = arith.constant 8 : i32
    %0 = arith.muli %arg1, %c8_i32 : i32
    %c1_i32 = arith.constant 1 : i32
    %1 = arith.subi %0, %c1_i32 : i32
    %c0_i32 = arith.constant 0 : i32
    %2 = arith.maxsi %1, %c0_i32 : i32
    %c0_i32_0 = arith.constant 0 : i32
    %c0_i32_1 = arith.constant 0 : i32
    %c0_i32_2 = arith.constant 0 : i32
    return %arg0, %2, %c0_i32_0, %c0_i32_1 : i32, i32, i32, i32
  }
  func.func @transform_2(%arg0: i32, %arg1: i32) -> (i32, i32, i32, i32) {
    %c8_i32 = arith.constant 8 : i32
    %0 = arith.muli %arg1, %c8_i32 : i32
    %c8_i32_0 = arith.constant 8 : i32
    %1 = arith.addi %0, %c8_i32_0 : i32
    %c15_i32 = arith.constant 15 : i32
    %2 = arith.minsi %1, %c15_i32 : i32
    %c0_i32 = arith.constant 0 : i32
    %c0_i32_1 = arith.constant 0 : i32
    %c0_i32_2 = arith.constant 0 : i32
    return %arg0, %2, %c0_i32, %c0_i32_1 : i32, i32, i32, i32
  }
  func.func @transform_3(%arg0: i32, %arg1: i32) -> (i32, i32) {
    %c0_i32 = arith.constant 0 : i32
    %c0_i32_0 = arith.constant 0 : i32
    %c0_i32_1 = arith.constant 0 : i32
    return %c0_i32, %c0_i32_0 : i32, i32
  }
  func.func @transform_4(%arg0: i32, %arg1: i32) -> (i32, i32, i32) {
    %c0_i32 = arith.constant 0 : i32
    %c0_i32_0 = arith.constant 0 : i32
    %c0_i32_1 = arith.constant 0 : i32
    %c0_i32_2 = arith.constant 0 : i32
    return %c0_i32, %c0_i32_0, %c0_i32_1 : i32, i32, i32
  }
  func.func @transform_5(%arg0: i32, %arg1: i32) -> (i32, i32) {
    %c0_i32 = arith.constant 0 : i32
    %c0_i32_0 = arith.constant 0 : i32
    %c0_i32_1 = arith.constant 0 : i32
    return %c0_i32, %c0_i32_0 : i32, i32
  }
  func.func @transform_6(%arg0: i32, %arg1: i32) -> (i32, i32) {
    %c0_i32 = arith.constant 0 : i32
    %c0_i32_0 = arith.constant 0 : i32
    %c0_i32_1 = arith.constant 0 : i32
    return %c0_i32, %c0_i32_0 : i32, i32
  }
  func.func @transform_7(%arg0: i32, %arg1: i32) -> (i32, i32) {
    %c0_i32 = arith.constant 0 : i32
    %c0_i32_0 = arith.constant 0 : i32
    %c0_i32_1 = arith.constant 0 : i32
    return %c0_i32, %c0_i32_0 : i32, i32
  }
  func.func @transform_8(%arg0: i32, %arg1: i32) -> (i32, i32) {
    %c0_i32 = arith.constant 0 : i32
    %c0_i32_0 = arith.constant 0 : i32
    %c0_i32_1 = arith.constant 0 : i32
    return %c0_i32, %c0_i32_0 : i32, i32
  }
  func.func @transform_9(%arg0: i32, %arg1: i32) -> (i32, i32, i32, i32) {
    %c0_i32 = arith.constant 0 : i32
    %c0_i32_0 = arith.constant 0 : i32
    %c0_i32_1 = arith.constant 0 : i32
    return %arg0, %arg1, %c0_i32, %c0_i32_0 : i32, i32, i32, i32
  }
}

</mosaic_0001>

<bundles_post_ra>
// kernel: tpu_custom_call.1
= control target key start
LH: loop header
LB: loop body
LE: loop exit
PB: predicated region body
PF: predicated region fallthrough
CT: control target
= control target key end

     0   :  { %s5240_s0 = inlined_call_operand.hbm [shape: bf16[2,16,16,128], index: 0, kind: input, shape index: {}]   ;;  %s5241_s1 = inlined_call_operand.hbm [shape: bf16[2,16,16,128], index: 1, kind: input, shape index: {}]   ;;  %s5242_s2 = inlined_call_operand.hbm [shape: bf16[2,16,16,128], index: 2, kind: input, shape index: {}]   ;;  %s5243_s3 = inlined_call_operand.hbm [shape: bf16[128,32], index: 3, kind: input, shape index: {}]   ;;  %s5244_s4 = inlined_call_operand.hbm [shape: bf16[3,96,32], index: 4, kind: input, shape index: {}]   ;;  %s5245_s5 = inlined_call_operand.hbm [shape: bf16[32,128], index: 5, kind: input, shape index: {}]   ;;  %s5246_s6 = inlined_call_operand.hbm [shape: f32[1,32], index: 6, kind: input, shape index: {}]   ;;  %s5247_s7 = inlined_call_operand.hbm [shape: f32[1,32], index: 7, kind: input, shape index: {}]   ;;  %s5248_s8 = inlined_call_operand.hbm [shape: f32[1,128], index: 8, kind: input, shape index: {}]   ;;  %s5249_s9 = inlined_call_operand.hbm [shape: bf16[2,16,16,128], index: 9, kind: output, shape index: {}]  }
   0x1   :  { %5278 = sst [smem:[#allocation38_spill]] %s5240_s0 }
   0x2   :  { %5279 = sst [smem:[#allocation39_spill]] %s5241_s1 }
   0x3   :  { %5280 = sst [smem:[#allocation40_spill]] %s5242_s2 }
   0x4   :  { %5281 = sst [smem:[#allocation41_spill]] %s5243_s3 }
   0x5   :  { %5282 = sst [smem:[#allocation42_spill]] %s5244_s4 }
   0x6   :  { %5283 = sst [smem:[#allocation43_spill]] %s5245_s5 }
   0x7   :  { %5284 = sst [smem:[#allocation44_spill]] %s5246_s6 }
   0x8   :  { %5285 = sst [smem:[#allocation45_spill]] %s5247_s7 }
   0x9   :  { %5286 = sst [smem:[#allocation46_spill]] %s5248_s8 }
   0xa   :  { %5287 = sst [smem:[#allocation47_spill]] %s5249_s9 }
   0xb   :  { %14 = vsyncpa [#allocation3], 0 }
   0xc   :  { %16 = vsyncpa [#allocation3 + $0x1], 0 }
   0xd   :  { %17 = vsyncpa [#allocation6], 0 }
   0xe   :  { %19 = vsyncpa [#allocation6 + $0x1], 0 }
   0xf   :  { %20 = vsyncpa [#allocation9], 0 }
  0x10   :  { %21 = vsyncpa [#allocation12], 0 }
  0x11   :  { %22 = vsyncpa [#allocation15], 0 }
  0x12   :  { %23 = vsyncpa [#allocation4], 0 }
  0x13   :  { %25 = vsyncpa [#allocation4 + $0x1], 0  ;;  %s4126_s30 = smov 0   ;;  %s4128_s10 = smov 0  }
  0x14   :  { %s4130_s11 = smov 0   ;;  %s4132_s12 = smov 0  }
  0x15   :  { %s4134_s13 = smov 0   ;;  %s4136_s14 = smov 0  }
  0x16   :  { %s4138_s15 = smov 0   ;;  %s4140_s16 = smov 0  }
  0x17   :  { %s4142_s17 = smov 0   ;;  %s4144_s18 = smov 0  }
  0x18   :  { %s4146_s19 = smov 0   ;;  %s4148_s20 = smov 0  }
  0x19   :  { %s4150_s21 = smov 0   ;;  %s4152_s22 = smov 0  }
  0x1a LB: > { %5288 = sst [smem:[#allocation25_spill]] %s4005_s30  ;;  %s4197_s23 = sadd.s32 4294967295, %s4057_s22   ;;  %s4057_s22 = sphi %s4152_s22, %s31_s22   ;;  %s4053_s21 = sphi %s4150_s21, %s5388_s21   ;;  %s4049_s20 = sphi %s4148_s20, %s5387_s20   ;;  %s4045_s19 = sphi %s4146_s19, %s5386_s19   ;;  %s4041_s18 = sphi %s4144_s18, %s5385_s18   ;;  %s4037_s17 = sphi %s4142_s17, %s5384_s17   ;;  %s4033_s16 = sphi %s4140_s16, %s5383_s16   ;;  %s4029_s15 = sphi %s4138_s15, %s5377_s15   ;;  %s4025_s14 = sphi %s4136_s14, %s5382_s14   ;;  %s4021_s13 = sphi %s4134_s13, %s5381_s13   ;;  %s4017_s12 = sphi %s4132_s12, %s5376_s12   ;;  %s4013_s11 = sphi %s4130_s11, %s5380_s11   ;;  %s4009_s10 = sphi %s4128_s10, %s5375_s10   ;;  %s4005_s30 = sphi %s4126_s30, %s5374_s30  }
  0x1b   : > { %5289 = sst [smem:[#allocation26_spill]] %s4009_s10  ;;  %p2894_p0 = scmp.ge.s32.totalorder %s4057_s22, 1 }
  0x1c   : > { %5290 = sst [smem:[#allocation27_spill]] %s4013_s11  ;;  %p5258_p1 = scmp.eq.s32.totalorder %s4197_s23, 0 }
  0x1d   : > { %5291 = sst [smem:[#allocation28_spill]] %s4021_s13  ;;  %p302_p2 = scmp.lt.s32.totalorder %s4057_s22, 5 }
  0x1e   : > { %5292 = sst [smem:[#allocation29_spill]] %s4029_s15  ;;  %s4059_s25 = smov [#allocation8]  }
  0x1f   : > { %5293 = sst [smem:[#allocation30_spill]] %s4033_s16  ;;  %p4202_p3 = pnand %p2894_p0, %p302_p2 }
  0x20   : > { %5294 = sst [smem:[#allocation31_spill]] %s4041_s18  ;;  %s314_s26 = sshll.u32 %s4059_s25, 4  ;;  %s4206_s26 = int_to_ptr.vmem [resolvable:$true] %s314_s26 }
  0x21   : > { %5295 = sst [smem:[#allocation32_spill]] %s4045_s19  ;;  %p3402_p4 = pneg %p4202_p3 }
  0x22   : > { %s5296_s24 = scalar_select %p4202_p3, 1, 0 }
  0x23   : > { %p4212_p5 = pnand %p3402_p4, %p5258_p1  ;;  %s4060_s28 = smov [#allocation11]  }
  0x24   : > { %5297 = sst [smem:[#allocation33_spill]] %s5296_s24  ;;  %s340_s29 = sshll.u32 %s4060_s28, 4  ;;  %s4216_s29 = int_to_ptr.vmem [resolvable:$true] %s340_s29 }
  0x25   : > { %s5298_s27 = scalar_select %p4212_p5, 1, 0 }
  0x26   : > { %s4061_s9 = smov [#allocation14]   ;;  %s5299_s3 = sld [smem:[#allocation41_spill]] }
  0x27   : > { %s4218_s19 = sshll.u32 %s4061_s9, 4  ;;  %p4228_p7 = pneg %p4212_p5  ;;  %s366_s19 = int_to_ptr.vmem [resolvable:$true] %s4218_s19 }
  0x2c   : > { %s3633_s25 = scalar_lea.hbm %s5299_s3, 1024 }
  0x2d   : > { %p3634_p6 = scmp.ne.s32.totalorder %s5299_s3, %s3633_s25  ;;  %p3640_p10 = scmp.lt.u32.totalorder %s3633_s25, %s5299_s3 }
  0x2f   : > { %p3636_p8 = pnand %p4228_p7, %p3634_p6 }
  0x31   : > { %p3637_p9 = pneg %p3636_p8 }
  0x33   : > { %p3642_p11 = pnand %p3640_p10, %p3637_p9 }
  0x35   : > { %3645 = shalt.err (!%p3642_p11)
}
  0x36   : > { %s3646_s2 = scalar_lea.vmem %s4206_s26, 1024  ;;  %p3654_p2 = scmp.lt.s32.totalorder %s4206_s26, %s4206_s26 }
  0x37   : > { %p3647_p12 = scmp.ne.s32.totalorder %s4206_s26, %s3646_s2  ;;  %p3655_p4 = scmp.lt.s32.totalorder %s3646_s2, %s3646_s2 }
  0x39   : > { %p3649_p13 = pnand %p3647_p12, %p4228_p7  ;;  %p3656_p6 = por %p3655_p4, %p3654_p2 }
  0x3b   : > { %p3650_p0 = pneg %p3649_p13 }
  0x3d   : > { %p3657_p8 = pnand %p3656_p6, %p3650_p0 }
  0x3f   : > { %3660 = shalt.err (!%p3657_p8)
}
  0x40   : > { %s5260_s30 = smov 64   ;;  %s5262_s18 = smov 4  }
  0x41   : > { %3405 = dma.hbm_to_vmem [thread:$0]  (!%p4212_p5), %s5299_s3, 1024, %s4206_s26, [#allocation9], %s5260_s30, %s5260_s30, %s5262_s18  }
  0x42   : > { %s5301_s5 = sld [smem:[#allocation43_spill]] }
  0x48   : > { %s3661_s2 = scalar_lea.hbm %s5301_s5, 256 }
  0x49   : > { %p3662_p9 = scmp.ne.s32.totalorder %s5301_s5, %s3661_s2  ;;  %p3668_p12 = scmp.lt.u32.totalorder %s3661_s2, %s5301_s5 }
  0x4b   : > { %p3664_p10 = pnand %p3662_p9, %p4228_p7 }
  0x4d   : > { %p3665_p11 = pneg %p3664_p10 }
  0x4f   : > { %p3670_p13 = pnand %p3668_p12, %p3665_p11 }
  0x51   : > { %3673 = shalt.err (!%p3670_p13)
}
  0x52   : > { %s3674_s26 = scalar_lea.vmem %s4216_s29, 256  ;;  %p3682_p6 = scmp.lt.s32.totalorder %s4216_s29, %s4216_s29 }
  0x53   : > { %p3675_p0 = scmp.ne.s32.totalorder %s4216_s29, %s3674_s26  ;;  %p3683_p8 = scmp.lt.s32.totalorder %s3674_s26, %s3674_s26 }
  0x55   : > { %p3677_p2 = pnand %p3675_p0, %p4228_p7  ;;  %p3684_p9 = por %p3683_p8, %p3682_p6 }
  0x57   : > { %p3678_p4 = pneg %p3677_p2 }
  0x59   : > { %p3685_p10 = pnand %p3684_p9, %p3678_p4 }
  0x5b   : > { %3688 = shalt.err (!%p3685_p10)
}
  0x5c   : > { %3411 = dma.hbm_to_vmem [thread:$0]  (!%p4212_p5), %s5301_s5, 256, %s4216_s29, [#allocation12], %s5260_s30, %s5260_s30, %s5262_s18  }
  0x5d   : > { %s5302_s7 = sld [smem:[#allocation45_spill]] }
  0x63   : > { %s3689_s24 = scalar_lea.hbm %s5302_s7, 16 }
  0x64   : > { %p3690_p11 = scmp.ne.s32.totalorder %s5302_s7, %s3689_s24  ;;  %p3696_p0 = scmp.lt.u32.totalorder %s3689_s24, %s5302_s7 }
  0x66   : > { %p3692_p12 = pnand %p3690_p11, %p4228_p7 }
  0x68   : > { %p3693_p13 = pneg %p3692_p12 }
  0x6a   : > { %p3698_p2 = pnand %p3696_p0, %p3693_p13 }
  0x6c   : > { %3701 = shalt.err (!%p3698_p2)
}
  0x6d   : > { %s3702_s26 = scalar_lea.vmem %s366_s19, 16  ;;  %s3709_s29 = scalar_lea.vmem %s366_s19, 32 }
  0x6e   : > { %p3703_p4 = scmp.ne.s32.totalorder %s366_s19, %s3702_s26  ;;  %p3710_p9 = scmp.lt.s32.totalorder %s366_s19, %s366_s19 }
  0x6f   : > { %p3711_p10 = scmp.lt.s32.totalorder %s3709_s29, %s3702_s26 }
  0x70   : > { %p3705_p6 = pnand %p3703_p4, %p4228_p7 }
  0x71   : > { %p3712_p1 = por %p3711_p10, %p3710_p9 }
  0x72   : > { %p3706_p8 = pneg %p3705_p6 }
  0x74   : > { %p3713_p3 = pnand %p3712_p1, %p3706_p8 }
  0x76   : > { %3716 = shalt.err (!%p3713_p3)
}
  0x77   : > { %3417 = dma.hbm_to_vmem [thread:$0]  (!%p4212_p5), %s5302_s7, 16, %s366_s19, [#allocation15]  }
  0x78   : > { %s40_s15 = sadd.s32 1, %s4049_s20  ;;  %s43_s16 = sadd.s32 1, %s4053_s21 }
  0x79   : > { %p41_p11 = scmp.ge.s32.totalorder %s40_s15, 2  ;;  %p5271_p12 = scmp.eq.s32.totalorder %s4057_s22, 0 }
  0x7a   : > { %s2888_s24 = sshll.u32 %s4049_s20, 3  ;;  %s88_s9 = sadd.s32 1, %s4025_s14 }
  0x7b   : > { %s5390_s15 = smov (%p41_p11, %s40_s15), 0  ;;  %s5392_s16 = smov (!%p41_p11, %s43_s16), %s4053_s21 }
  0x7c   : > { %5303 = sst [smem:[#allocation34_spill]] %s5390_s15  ;;  %s48_s25 = ssub.s32 %s4049_s20, %s5390_s15 }
  0x7d   : > { %s2889_s28 = sadd.s32 4294967295, %s2888_s24  ;;  %p45_p1 = scmp.ge.s32.totalorder %s5392_s16, 2 }
  0x7e   : > { %p77_p3 = scmp.gt.s32.totalorder %s2889_s28, 0  ;;  %s2890_s19 = sshll.u32 %s5390_s15, 3 }
  0x7f   : > { %s5394_s16 = smov (%p45_p1, %s5392_s16), 0  ;;  %s2891_s26 = sadd.s32 4294967295, %s2890_s19 }
  0x80   : > { %5304 = sst [smem:[#allocation35_spill]] %s5394_s16  ;;  %s5396_s28 = smov (!%p77_p3, %s2889_s28), 0 }
  0x81   : > { %s4312_s2 = ssub.s32 %s4053_s21, %s5394_s16  ;;  %p81_p13 = scmp.gt.s32.totalorder %s2891_s26, 0 }
  0x82   : > { %5305 = sst [smem:[#allocation36_spill]] %s4312_s2  ;;  %s4315_s29 = sor.u32 %s48_s25, %s4312_s2 }
  0x83   : > { %p95_p2 = scmp.ne.s32.totalorder %s4025_s14, %s4021_s13  ;;  %s5398_s26 = smov (!%p81_p13, %s2891_s26), 0 }
  0x84   : > { %p101_p6 = scmp.ne.s32.totalorder %s4021_s13, %s4017_s12  ;;  %s84_s11 = ssub.s32 %s5396_s28, %s5398_s26 }
  0x85   : > { %p4322_p4 = por %p95_p2, %p5271_p12  ;;  %s4328_s30 = sadd.s32 8, %s2888_s24 }
  0x86   : > { %s85_s25 = sor.u32 %s84_s11, %s4312_s2  ;;  %p5307_p8 = scmp.eq.s32.totalorder %s4197_s23, 0 }
  0x87   : > { %p86_p10 = scmp.eq.s32.totalorder %s85_s25, 0  ;;  %s4338_s3 = sadd.s32 8, %s2890_s19 }
  0x88   : > { %p4333_p9 = por %p101_p6, %p5307_p8  ;;  %p5270_p1 = scmp.lt.s32.totalorder %s4057_s22, 4 }
  0x89   : > { %s4342_s5 = scalar_select %p86_p10, %s4025_s14, %s88_s9  }
  0x8a   : > { %s5308_s18 = scalar_select %p4333_p9, 1, 0 }
  0x8b   : > { %s4346_s12 = sshll.u32 %s4053_s21, 5  ;;  %s411_s24 = sand.u32 1, %s4057_s22  }
  0x8c   : > { %5309 = sst [smem:[#allocation37_spill]] %s5308_s18  ;;  %s413_s26 = sand.u32 1, %s4025_s14  }
  0x8d   : > { %s2907_s11 = sshll.u32 %s413_s26, 3  ;;  %s2910_s7 = sshll.u32 %s5396_s28, 1 }
  0x8e   : > { %s425_s16 = sadd.s32 %s2910_s7, %s4346_s12  ;;  %s415_s15 = scalar_lea.vmem [#allocation5], %s2907_s11 }
  0x8f   : > { %s428_s25 = sshll.u32 %s415_s15, 4  ;;  %s2912_s18 = sshll.u32 %s425_s16, 6  ;;  %s4351_s25 = int_to_ptr.vmem [resolvable:$true] %s428_s25 }
  0x90   : > { %s5310_s1 = sld [smem:[#allocation39_spill]]  ;;  %p4362_p13 = pnand %p5270_p1, %p4322_p4 }
  0x91   : > { %s4064_s7 = smov [#allocation10]   ;;  %s4368_s16 = scalar_lea.sflag [#allocation6], %s411_s24 }
  0x92   : > { %s4366_s15 = sshll.u32 %s4064_s7, 4  ;;  %p3719_p6 = pneg %p4362_p13  ;;  %s328_s15 = int_to_ptr.vmem [resolvable:$true] %s4366_s15 }
  0x96   : > { %s4356_s2 = scalar_lea.hbm %s5310_s1, %s2912_s18  ;;  %s3722_s0 = scalar_lea.hbm %s5310_s1, 4096 }
  0x97   : > { %s3717_s13 = scalar_lea.hbm %s4356_s2, 128  ;;  %p3723_p4 = scmp.lt.u32.totalorder %s4356_s2, %s5310_s1 }
  0x98   : > { %p3718_p2 = scmp.ne.s32.totalorder %s4356_s2, %s3717_s13  ;;  %p3724_p3 = scmp.lt.u32.totalorder %s3722_s0, %s3717_s13 }
  0x99   : > { %p3726_p1 = scmp.lt.u32.totalorder %s3717_s13, %s4356_s2 }
  0x9a   : > { %p3720_p8 = pnand %p3719_p6, %p3718_p2  ;;  %p3725_p11 = por %p3724_p3, %p3723_p4 }
  0x9c   : > { %p3721_p10 = pneg %p3720_p8  ;;  %p3727_p12 = por %p3726_p1, %p3725_p11 }
  0x9e   : > { %p3728_p0 = pnand %p3727_p12, %p3721_p10 }
  0xa0   : > { %3731 = shalt.err (!%p3728_p0)
}
  0xa1   : > { %s3732_s24 = scalar_lea.vmem %s4351_s25, 128  ;;  %s4065_s19 = smov [#allocation5]  }
  0xa2   : > { %p3733_p2 = scmp.ne.s32.totalorder %s4351_s25, %s3732_s24  ;;  %s3737_s7 = sshll.u32 %s4065_s19, 4  ;;  %s3738_s7 = int_to_ptr.vmem [resolvable:$false] %s3737_s7 }
  0xa3   : > { %s3739_s18 = scalar_lea.vmem %s3738_s7, 256  ;;  %p3740_p5 = scmp.lt.s32.totalorder %s4351_s25, %s3738_s7 }
  0xa4   : > { %p3735_p8 = pnand %p3733_p2, %p3719_p6  ;;  %p3741_p3 = scmp.lt.s32.totalorder %s3739_s18, %s3732_s24 }
  0xa6   : > { %p3736_p9 = pneg %p3735_p8  ;;  %p3742_p4 = por %p3741_p3, %p3740_p5 }
  0xa8   : > { %p3743_p11 = pnand %p3742_p4, %p3736_p9 }
  0xaa   : > { %3746 = shalt.err (!%p3743_p11)
}
  0xab   : > { %s5312_s13 = smov 4   ;;  %s5313_s28 = smov 64  }
  0xac   : > { %3427 = dma.hbm_to_vmem [thread:$0]  (!%p4362_p13), %s4356_s2, 128, %s4351_s25, %s4368_s16, %s5313_s28, %s5313_s28, %s5312_s13  }
  0xad   : > { %s4066_s0 = smov [#allocation13]   ;;  %s5314_s4 = sld [smem:[#allocation42_spill]] }
  0xae   : > { %s354_s26 = sshll.u32 %s4066_s0, 4  ;;  %s355_s26 = int_to_ptr.vmem [resolvable:$true] %s354_s26 }
  0xb3   : > { %s3747_s24 = scalar_lea.hbm %s5314_s4, 2304 }
  0xb4   : > { %p3748_p5 = scmp.ne.s32.totalorder %s5314_s4, %s3747_s24  ;;  %p3754_p9 = scmp.lt.u32.totalorder %s3747_s24, %s5314_s4 }
  0xb6   : > { %p3750_p12 = pnand %p3748_p5, %p4228_p7 }
  0xb8   : > { %p3751_p0 = pneg %p3750_p12 }
  0xba   : > { %p3756_p1 = pnand %p3754_p9, %p3751_p0 }
  0xbc   : > { %3759 = shalt.err (!%p3756_p1)
}
  0xbd   : > { %s3760_s2 = scalar_lea.vmem %s328_s15, 2304  ;;  %p3768_p2 = scmp.lt.s32.totalorder %s328_s15, %s328_s15 }
  0xbe   : > { %p3761_p13 = scmp.ne.s32.totalorder %s328_s15, %s3760_s2  ;;  %p3769_p8 = scmp.lt.s32.totalorder %s3760_s2, %s3760_s2 }
  0xc0   : > { %p3763_p6 = pnand %p3761_p13, %p4228_p7  ;;  %p3770_p3 = por %p3769_p8, %p3768_p2 }
  0xc2   : > { %p3764_p10 = pneg %p3763_p6 }
  0xc4   : > { %p3771_p4 = pnand %p3770_p3, %p3764_p10 }
  0xc6   : > { %3774 = shalt.err (!%p3771_p4)
}
  0xc7   : > { %p5315_p11 = scmp.ne.s32.totalorder %s5298_s27, 0  ;;  %s5316_s6 = sld [smem:[#allocation44_spill]] }
  0xc9   : > { %3408 = dma.hbm_to_vmem [thread:$0]  (!%p5315_p11), %s5314_s4, 2304, %s328_s15, [#allocation9], %s5313_s28, %s5313_s28, %s5312_s13  }
  0xcd   : > { %s3775_s19 = scalar_lea.hbm %s5316_s6, 16 }
  0xce   : > { %p3776_p5 = scmp.ne.s32.totalorder %s5316_s6, %s3775_s19  ;;  %p3782_p9 = scmp.lt.u32.totalorder %s3775_s19, %s5316_s6 }
  0xd0   : > { %p3778_p12 = pnand %p3776_p5, %p4228_p7 }
  0xd2   : > { %p3779_p0 = pneg %p3778_p12 }
  0xd4   : > { %p3784_p1 = pnand %p3782_p9, %p3779_p0 }
  0xd6   : > { %3787 = shalt.err (!%p3784_p1)
}
  0xd7   : > { %s3788_s2 = scalar_lea.vmem %s355_s26, 16  ;;  %s3795_s15 = scalar_lea.vmem %s355_s26, 32 }
  0xd8   : > { %p3789_p13 = scmp.ne.s32.totalorder %s355_s26, %s3788_s2  ;;  %p3796_p2 = scmp.lt.s32.totalorder %s355_s26, %s355_s26 }
  0xd9   : > { %p3797_p8 = scmp.lt.s32.totalorder %s3795_s15, %s3788_s2 }
  0xda   : > { %p3791_p6 = pnand %p3789_p13, %p4228_p7 }
  0xdb   : > { %p3798_p3 = por %p3797_p8, %p3796_p2 }
  0xdc   : > { %p3792_p10 = pneg %p3791_p6 }
  0xde   : > { %p3799_p4 = pnand %p3798_p3, %p3792_p10 }
  0xe0   : > { %3802 = shalt.err (!%p3799_p4)
}
  0xe1   : > { %3414 = dma.hbm_to_vmem [thread:$0]  (!%p5315_p11), %s5316_s6, 16, %s355_s26, [#allocation12]  }
  0xe2   : > { %s4067_s0 = smov [#allocation16]   ;;  %s5317_s8 = sld [smem:[#allocation46_spill]] }
  0xe3   : > { %s376_s11 = sshll.u32 %s4067_s0, 4  ;;  %s377_s11 = int_to_ptr.vmem [resolvable:$true] %s376_s11 }
  0xe8   : > { %s3803_s7 = scalar_lea.hbm %s5317_s8, 16 }
  0xe9   : > { %p3804_p5 = scmp.ne.s32.totalorder %s5317_s8, %s3803_s7  ;;  %p3810_p9 = scmp.lt.u32.totalorder %s3803_s7, %s5317_s8 }
  0xeb   : > { %p3806_p12 = pnand %p3804_p5, %p4228_p7 }
  0xed   : > { %p3807_p0 = pneg %p3806_p12 }
  0xef   : > { %p3812_p1 = pnand %p3810_p9, %p3807_p0 }
  0xf1   : > { %3815 = shalt.err (!%p3812_p1)
}
  0xf2   : > { %s3816_s26 = scalar_lea.vmem %s377_s11, 16  ;;  %s3823_s1 = scalar_lea.vmem %s377_s11, 32 }
  0xf3   : > { %p3817_p13 = scmp.ne.s32.totalorder %s377_s11, %s3816_s26  ;;  %p3824_p2 = scmp.lt.s32.totalorder %s377_s11, %s377_s11 }
  0xf4   : > { %p3825_p8 = scmp.lt.s32.totalorder %s3823_s1, %s3816_s26 }
  0xf5   : > { %p3819_p6 = pnand %p3817_p13, %p4228_p7 }
  0xf6   : > { %p3826_p3 = por %p3825_p8, %p3824_p2 }
  0xf7   : > { %p3820_p10 = pneg %p3819_p6 }
  0xf9   : > { %p3827_p4 = pnand %p3826_p3, %p3820_p10 }
  0xfb   : > { %3830 = shalt.err (!%p3827_p4)
}
  0xfc   : > { %s5318_s19 = sld [smem:[#allocation30_spill]]  ;;  %s5319_s10 = sld [smem:[#allocation29_spill]] }
  0xfd   : > { %3420 = dma.hbm_to_vmem [thread:$0]  (!%p5315_p11), %s5317_s8, 16, %s377_s11, [#allocation15]  }
  0xfe   : > { %s2887_s24 = sadd.s32 4294967294, %s4057_s22   ;;  %s52_s27 = sadd.s32 1, %s4037_s17 }
  0xff   : > { %p5320_p7 = scmp.eq.s32.totalorder %s4315_s29, 0  ;;  %p289_p0 = scmp.eq.s32.totalorder %s4197_s23, 3 }
 0x100   : > { %p295_p9 = scmp.eq.s32.totalorder %s2887_s24, 3  ;;  %p5321_p1 = scmp.eq.s32.totalorder %s4057_s22, 0 }
 0x101   : > { %s4462_s7 = scalar_select %p5320_p7, %s4037_s17, %s52_s27  }
 0x102   : > { %p59_p5 = scmp.ne.s32.totalorder %s4037_s17, %s5318_s19  ;;  %p65_p12 = scmp.ne.s32.totalorder %s5318_s19, %s5319_s10 }
 0x103   : > { %p5323_p6 = scmp.eq.s32.totalorder %s4197_s23, 0  ;;  %s387_s2 = sand.u32 1, %s4037_s17  }
 0x104   : > { %p4471_p13 = por %p5321_p1, %p59_p5  ;;  %p4481_p11 = por %p289_p0, %p59_p5 }
 0x105   : > { %p4477_p10 = por %p5323_p6, %p65_p12  ;;  %p4485_p2 = por %p295_p9, %p65_p12 }
 0x106   : > { %s5325_s29 = scalar_select %p4481_p11, 1, 0 }
 0x107   : > { %s5326_s11 = scalar_select %p4485_p2, 1, 0 }
 0x108   : > { %s3051_s15 = sshll.u32 %s4049_s20, 4  ;;  %s2902_s26 = sshll.u32 %s387_s2, 6 }
 0x109   : > { %s398_s1 = sadd.s32 %s3051_s15, %s4346_s12  ;;  %s391_s0 = scalar_lea.vmem [#allocation2], %s2902_s26 }
 0x10a   : > { %s2906_s25 = sshll.u32 %s398_s1, 6  ;;  %s401_s19 = sshll.u32 %s391_s0, 4  ;;  %s4497_s19 = int_to_ptr.vmem [resolvable:$true] %s401_s19 }
 0x10b   : > { %s5327_s27 = sld [smem:[#allocation38_spill]]  ;;  %p5328_p8 = scmp.lt.s32.totalorder %s4057_s22, 4 }
 0x10c   : > { %s4507_s15 = scalar_lea.sflag [#allocation3], %s387_s2 }
 0x10d   : > { %p4503_p3 = pnand %p5328_p8, %p4471_p13 }
 0x10f   : > { %p3833_p7 = pneg %p4503_p3 }
 0x111   : > { %s4495_s4 = scalar_lea.hbm %s5327_s27, %s2906_s25  ;;  %s3836_s18 = scalar_lea.hbm %s5327_s27, 4096 }
 0x112   : > { %s3831_s26 = scalar_lea.hbm %s4495_s4, 1024  ;;  %p3837_p0 = scmp.lt.u32.totalorder %s4495_s4, %s5327_s27 }
 0x113   : > { %p3832_p4 = scmp.ne.s32.totalorder %s4495_s4, %s3831_s26  ;;  %p3838_p9 = scmp.lt.u32.totalorder %s3836_s18, %s3831_s26 }
 0x114   : > { %p3840_p13 = scmp.lt.u32.totalorder %s3831_s26, %s4495_s4 }
 0x115   : > { %p3834_p5 = pnand %p3833_p7, %p3832_p4  ;;  %p3839_p1 = por %p3838_p9, %p3837_p0 }
 0x117   : > { %p3835_p12 = pneg %p3834_p5  ;;  %p3841_p6 = por %p3840_p13, %p3839_p1 }
 0x119   : > { %p3842_p8 = pnand %p3841_p6, %p3835_p12 }
 0x11b   : > { %3845 = shalt.err (!%p3842_p8)
}
 0x11c   : > { %s3846_s2 = scalar_lea.vmem %s4497_s19, 1024  ;;  %s4068_s24 = smov [#allocation2]  }
 0x11d   : > { %p3847_p4 = scmp.ne.s32.totalorder %s4497_s19, %s3846_s2  ;;  %s3851_s1 = sshll.u32 %s4068_s24, 4  ;;  %s3852_s1 = int_to_ptr.vmem [resolvable:$false] %s3851_s1 }
 0x11e   : > { %s3853_s25 = scalar_lea.vmem %s3852_s1, 2048  ;;  %p3854_p11 = scmp.lt.s32.totalorder %s4497_s19, %s3852_s1 }
 0x11f   : > { %p3849_p5 = pnand %p3847_p4, %p3833_p7  ;;  %p3855_p0 = scmp.lt.s32.totalorder %s3853_s25, %s3846_s2 }
 0x121   : > { %p3850_p2 = pneg %p3849_p5  ;;  %p3856_p9 = por %p3855_p0, %p3854_p11 }
 0x123   : > { %p3857_p1 = pnand %p3856_p9, %p3850_p2 }
 0x125   : > { %3860 = shalt.err (!%p3857_p1)
}
 0x126   : > { %s5330_s26 = sld [smem:[#allocation27_spill]]  ;;  %s5331_s18 = sld [smem:[#allocation26_spill]] }
 0x127   : > { %s5332_s0 = sld [smem:[#allocation25_spill]]  ;;  %s5333_s10 = sld [smem:[#allocation36_spill]] }
 0x128   : > { %3424 = dma.hbm_to_vmem [thread:$0]  (!%p4503_p3), %s4495_s4, 1024, %s4497_s19, %s4507_s15, %s5313_s28, %s5313_s28, %s5312_s13  }
 0x129   : > { %p5334_p11 = scmp.lt.s32.totalorder %s4328_s30, 15  ;;  %p5335_p2 = scmp.lt.s32.totalorder %s4338_s3, 15 }
 0x12a   : > { %p5336_p13 = scmp.eq.s32.totalorder %s4057_s22, 0  ;;  %p5338_p4 = scmp.eq.s32.totalorder %s4197_s23, 0 }
 0x12b   : > { %s5400_s30 = smov (!%p5334_p11, %s4328_s30), 15  ;;  %s5402_s3 = smov (!%p5335_p2, %s4338_s3), 15 }
 0x12c   : > { %s124_s6 = sadd.s32 1, %s5330_s26  ;;  %p131_p7 = scmp.ne.s32.totalorder %s5330_s26, %s5331_s18 }
 0x12d   : > { %s120_s2 = ssub.s32 %s5400_s30, %s5402_s3  ;;  %p137_p12 = scmp.ne.s32.totalorder %s5331_s18, %s5332_s0 }
 0x12e   : > { %s121_s24 = sor.u32 %s120_s2, %s5333_s10  ;;  %p4552_p6 = por %p131_p7, %p5336_p13 }
 0x12f   : > { %p122_p8 = scmp.eq.s32.totalorder %s121_s24, 0  ;;  %p4558_p5 = por %p137_p12, %p5338_p4 }
 0x130   : > { %s440_s19 = sand.u32 1, %s5330_s26   ;;  %s2915_s15 = sshll.u32 %s5400_s30, 1 }
 0x131   : > { %s5339_s4 = scalar_select %p4558_p5, 1, 0 }
 0x132   : > { %s5404_s26 = smov (!%p122_p8, %s5330_s26), %s124_s6  ;;  %s2913_s3 = sshll.u32 %s440_s19, 3 }
 0x133   : > { %s452_s25 = sadd.s32 %s2915_s15, %s4346_s12  ;;  %s5340_s2 = sld [smem:[#allocation40_spill]] }
 0x134   : > { %s2917_s18 = sshll.u32 %s452_s25, 6  ;;  %s442_s24 = scalar_lea.vmem [#allocation7], %s2913_s3 }
 0x135   : > { %s455_s27 = sshll.u32 %s442_s24, 4  ;;  %p5341_p3 = scmp.lt.s32.totalorder %s4057_s22, 4  ;;  %s4572_s27 = int_to_ptr.vmem [resolvable:$true] %s455_s27 }
 0x137   : > { %p4578_p0 = pnand %p5341_p3, %p4552_p6 }
 0x139   : > { %s4570_s8 = scalar_lea.hbm %s5340_s2, %s2917_s18  ;;  %p3863_p1 = pneg %p4578_p0 }
 0x13a   : > { %s3861_s12 = scalar_lea.hbm %s4570_s8, 128  ;;  %s3866_s15 = scalar_lea.hbm %s5340_s2, 4096 }
 0x13b   : > { %p3862_p9 = scmp.ne.s32.totalorder %s4570_s8, %s3861_s12  ;;  %p3867_p7 = scmp.lt.u32.totalorder %s4570_s8, %s5340_s2 }
 0x13c   : > { %p3868_p12 = scmp.lt.u32.totalorder %s3866_s15, %s3861_s12  ;;  %p3870_p6 = scmp.lt.u32.totalorder %s3861_s12, %s4570_s8 }
 0x13d   : > { %p3864_p11 = pnand %p3863_p1, %p3862_p9 }
 0x13e   : > { %p3869_p13 = por %p3868_p12, %p3867_p7 }
 0x13f   : > { %p3865_p2 = pneg %p3864_p11 }
 0x140   : > { %p3871_p8 = por %p3870_p6, %p3869_p13 }
 0x142   : > { %p3872_p4 = pnand %p3871_p8, %p3865_p2 }
 0x144   : > { %3875 = shalt.err (!%p3872_p4)
}
 0x145   : > { %s3876_s25 = scalar_lea.vmem %s4572_s27, 128  ;;  %s4069_s18 = smov [#allocation7]  }
 0x146   : > { %p3877_p3 = scmp.ne.s32.totalorder %s4572_s27, %s3876_s25  ;;  %s3881_s0 = sshll.u32 %s4069_s18, 4  ;;  %s3882_s0 = int_to_ptr.vmem [resolvable:$false] %s3881_s0 }
 0x147   : > { %s3883_s10 = scalar_lea.vmem %s3882_s0, 256  ;;  %p3884_p5 = scmp.lt.s32.totalorder %s4572_s27, %s3882_s0 }
 0x148   : > { %p3879_p9 = pnand %p3877_p3, %p3863_p1  ;;  %p3885_p7 = scmp.lt.s32.totalorder %s3883_s10, %s3876_s25 }
 0x14a   : > { %p3880_p11 = pneg %p3879_p9  ;;  %p3886_p12 = por %p3885_p7, %p3884_p5 }
 0x14c   : > { %p3887_p13 = pnand %p3886_p12, %p3880_p11 }
 0x14e   : > { %3890 = shalt.err (!%p3887_p13)
}
 0x14f   : > { %3430 = dma.hbm_to_vmem [thread:$0]  (!%p4578_p0), %s4570_s8, 128, %s4572_s27, %s4368_s16, %s5313_s28, %s5313_s28, %s5312_s13  }
 0x150   : > { %s5343_s24 = sld [smem:[#allocation33_spill]] }
 0x156   : > { %p5344_p1 = scmp.ne.s32.totalorder %s5343_s24, 0 }
 0x157   : > { %s5345_s12 = sld [smem:[#allocation30_spill]] (!%p5344_p1) }
 0x158   : > { %467 = sbr.rel (%p5344_p1) target bundleno = 1336 (0x538), region = 56 }
 0x15d   : > { %s4614_s6 = sand.u32 (!%p5344_p1), 1, %s5345_s12  }
 0x15e   : > { %s2919_s19 = sshll.u32 (!%p5344_p1), %s4614_s6, 6  ;;  %s470_s15 = scalar_lea.sflag (!%p5344_p1), [#allocation3], %s4614_s6 }
 0x15f   : > { %s4620_s30 = scalar_lea.vmem [#allocation2], %s2919_s19 }
 0x160   : > { %3976 = dma.done.wait (%p4477_p10), %s470_s15, 1024  }
 0x161   : > { %3978 = vsyncadd (%p4477_p10), %s470_s15, 4294966272  ;;  %s5346_s8 = sld [smem:[#allocation28_spill]]  ;;  %s5347_s16 = sld [smem:[#allocation37_spill]] }
 0x162   : > { %s478_s13 = sand.u32 1, %s4197_s23  }
 0x163   : > { %s479_s1 = scalar_lea.sflag [#allocation6], %s478_s13 }
 0x167   : > { %s480_s28 = sand.u32 1, %s5346_s8   ;;  %p5348_p5 = scmp.ne.s32.totalorder %s5347_s16, 0 }
 0x168   : > { %s2920_s27 = sshll.u32 %s480_s28, 3 }
 0x169   : > { %s482_s3 = scalar_lea.vmem [#allocation5], %s2920_s27 }
 0x16a   : > { %3980 = dma.done.wait (%p5348_p5), %s479_s1, 128  }
 0x16b   : > { %3982 = vsyncadd (%p5348_p5), %s479_s1, 4294967168  ;;  %s5349_s25 = sld [smem:[#allocation26_spill]]  ;;  %p5350_p10 = scmp.ne.s32.totalorder %s5339_s4, 0 }
 0x171   : > { %s489_s18 = sand.u32 1, %s5349_s25  }
 0x172   : > { %s4633_s0 = sshll.u32 %s489_s18, 3 }
 0x173   : > { %s491_s9 = scalar_lea.vmem [#allocation7], %s4633_s0 }
 0x174   : > { %3984 = dma.done.wait (%p5350_p10), %s479_s1, 128  }
 0x175   : > { %3986 = vsyncadd (%p5350_p10), %s479_s1, 4294967168  ;;  %p5351_p0 = scmp.eq.s32.totalorder %s4197_s23, 0 }
 0x177   : > { %3988 = dma.done.wait (%p5351_p0), [#allocation9], 3328   ;;  %p5352_p2 = pmov %p5351_p0 }
 0x178   : > { %p5353_p6 = pmov %p5351_p0 }
 0x179   : > { %3990 = vsyncadd (%p5352_p2), [#allocation9], 4294963968 }
 0x17a   : > { %3992 = dma.done.wait (%p5353_p6), [#allocation12], 272   ;;  %p5354_p8 = pmov %p5351_p0 }
 0x17b   : > { %p5355_p4 = pmov %p5351_p0 }
 0x17c   : > { %3994 = vsyncadd (%p5354_p8), [#allocation12], 4294967024 }
 0x17d   : > { %3996 = dma.done.wait (%p5355_p4), [#allocation15], 32   ;;  %p5356_p3 = pmov %p5351_p0 }
 0x17e   : > { %v3579_v0 = vld [vmem:[#allocation8] sm:$0xff]   ;;  %v3580_v1 = vld [vmem:[#allocation8 + $0x8] sm:$0xff]   ;;  %v3581_v2 = vld [vmem:[#allocation8 + $0x10] sm:$0xff]   ;;  %s5357_s23 = sld [smem:[#allocation31_spill]]  ;;  %v865_v18 = vlaneseq  ;;  %v4070_v32 = vmov 0.0   ;;  %v4071_v50 = vmov 1.0  }
 0x17f   : > { %3998 = vsyncadd (%p5356_p3), [#allocation15], 4294967264  ;;  %3186 = vmatprep.subr.bf16.mxu0 %v3579_v0  ;;  %v3582_v3 = vld [vmem:[#allocation8 + $0x18] sm:$0xff]   ;;  %v3587_v4 = vld [vmem:[%s482_s3] sm:$0xff]   ;;  %vm1613_vm8 = vcmask 1046528   ;;  %s4072_s24 = smov 64  }
 0x180   : > { %3187 = vmatpush3.bf16.msra.mxu0 %v3579_v0  ;;  %3202 = vmatprep.mubr.bf16.mxu0 %v3587_v4  ;;  %v3583_v5 = vld [vmem:[#allocation8 + $0x20] sm:$0xff]   ;;  %v3584_v6 = vld [vmem:[#allocation8 + $0x28] sm:$0xff]   ;;  %v3585_v7 = vld [vmem:[#allocation8 + $0x30] sm:$0xff]   ;;  %v4663_v19 = vshrl.u32 %v865_v18, 7  ;;  %vm1522_vm10 = vsmask.f32 7424 }
 0x181   : > { %3188 = vmatprep.subr.bf16.mxu0 %v3580_v1  ;;  %v3586_v8 = vld [vmem:[#allocation8 + $0x38] sm:$0xff]   ;;  %v571_v9 = vld [vmem:[%s4620_s30] sm:$0xff]   ;;  %v573_v10 = vld [vmem:[%s4620_s30 + $0x8] sm:$0xff]   ;;  %s4073_s12 = smov 32   ;;  %s5128_s15 = scalar_lea.vmem [#allocation17], %s2919_s19 }
 0x182   : > { %v575_v11 = vld [vmem:[%s4620_s30 + $0x10] sm:$0xff]   ;;  %v577_v12 = vld [vmem:[%s4620_s30 + $0x18] sm:$0xff]   ;;  %v579_v13 = vld [vmem:[%s4620_s30 + $0x20] sm:$0xff]   ;;  %v870_v20 = vadd.s32 32, %v4663_v19  ;;  %v868_v21 = vadd.s32 16, %v4663_v19  ;;  %v874_v24 = vadd.s32 64, %v4663_v19 }
 0x183   : > { %v581_v14 = vld [vmem:[%s4620_s30 + $0x28] sm:$0xff]   ;;  %v583_v15 = vld [vmem:[%s4620_s30 + $0x30] sm:$0xff]   ;;  %v585_v16 = vld [vmem:[%s4620_s30 + $0x38] sm:$0xff]   ;;  %v872_v25 = vadd.s32 48, %v4663_v19  ;;  %v876_v27 = vadd.s32 80, %v4663_v19  ;;  %v878_v28 = vadd.s32 96, %v4663_v19 }
 0x184   : > { %3189 = vmatpush3.bf16.msra.mxu0 %v3580_v1  ;;  %v3596_v17 = vld [vmem:[%s491_s9] sm:$0xff]   ;;  %p906_p9 = scmp.gt.s32.totalorder %s5357_s23, 0  ;;  %v1090_v23 = vand.u32 15, %v870_v20  ;;  %v1076_v26 = vand.u32 15, %v868_v21  ;;  %v880_v29 = vadd.s32 112, %v4663_v19  ;;  %v1118_v31 = vand.u32 15, %v874_v24 }
 0x185   : > { %3190 = vmatprep.subr.bf16.mxu0 %v3581_v2  ;;  %v4672_v30 = vld [vmem:[#allocation13] ss:$0 sm:$0xff]  ;;  %v1104_v34 = vand.u32 15, %v872_v25  ;;  %v1132_v37 = vand.u32 15, %v876_v27  ;;  %v1146_v38 = vand.u32 15, %v878_v28  ;;  %v882_v39 = vadd.s32 128, %v4663_v19 }
 0x186   : > { %s907_s4 = scalar_select %p906_p9, 1, 0  ;;  %vm1436_vm1 = vcmp.ne.s32.totalorder %v1090_v23, 0  ;;  %vm4675_vm2 = vcmp.ne.s32.totalorder %v1076_v26, 0  ;;  %v1160_v43 = vand.u32 15, %v880_v29  ;;  %vm1440_vm3 = vcmp.ne.s32.totalorder %v1118_v31, 0 }
 0x187   : > { %v2964_v40 = vsel %vm1436_vm1, 1.0, %v4070_v32  ;;  %vm1438_vm4 = vcmp.ne.s32.totalorder %v1104_v34, 0  ;;  %p950_p11 = scmp.lt.s32.totalorder %s5357_s23, 1  ;;  %v2963_v49 = vsel %vm4675_vm2, 1.0, %v4070_v32  ;;  %vm1442_vm5 = vcmp.ne.s32.totalorder %v1132_v37, 0  ;;  %v3597_v18 = vld [vmem:[#allocation10 + $0x30] sm:$0xff]  }
 0x188   : > { %3191 = vmatpush3.bf16.msra.mxu0 %v3581_v2  ;;  %v908_v22 = vstv %s907_s4  ;;  %v1501_v51 = vpack.c.bf16 %v4071_v50, %v2964_v40  ;;  %vm1444_vm6 = vcmp.ne.s32.totalorder %v1146_v38, 0  ;;  %v1174_v53 = vand.u32 15, %v882_v39  ;;  %3326 = vmatprep.subr.bf16.mxu1 %v3597_v18  ;;  %s5368_s19 = sld [smem:[#allocation32_spill]]  ;;  %s3068_s8 = sshll.u32 %s5357_s23, 4 }
 0x189   : > { %3192 = vmatprep.subr.bf16.mxu0 %v3582_v3  ;;  %vm909_vm0 = vcmp.eq.s32.totalorder %v908_v22, 1  ;;  %v2966_v56 = vsel %vm1440_vm3, 1.0, %v4070_v32  ;;  %vm1446_vm7 = vcmp.ne.s32.totalorder %v1160_v43, 0  ;;  %v2965_v59 = vsel %vm1438_vm4, 1.0, %v4070_v32  ;;  %s4696_s10 = scalar_select %p950_p11, 1, 0  ;;  %3332 = vmatpush3.bf16.msra.mxu1 %v3597_v18 }
 0x18a   : > { %v2948_v33 = vsel %vm909_vm0, 1.0, %v4070_v32  ;;  %v1500_v60 = vpack.c.bf16 %v4071_v50, %v2963_v49  ;;  %v2967_v62 = vsel %vm1442_vm5, 1.0, %v4070_v32  ;;  %v2968_v63 = vsel %vm1444_vm6, 1.0, %v4070_v32  ;;  %s2690_s13 = sshll.u32 %s5128_s15, 4  ;;  %s5369_s3 = sld [smem:[#allocation47_spill]]  ;;  %s5153_s13 = int_to_ptr.vmem [resolvable:$true] %s2690_s13 }
 0x18b   : > { %v1034_v46 = vpack.c.bf16 %v2948_v33, %v2948_v33  ;;  %v4700_v2 = vpack.c.bf16 %v4071_v50, %v2966_v56  ;;  %vm1448_vm9 = vcmp.ne.s32.totalorder %v1174_v53, 0  ;;  %v884_v21 = vadd.s32 144, %v4663_v19  ;;  %s2674_s18 = scalar_lea.sflag [#allocation4], %s4614_s6  ;;  %s3891_s0 = scalar_lea.vmem %s5153_s13, 1024 }
 0x18c   : > { %3193 = vmatpush3.bf16.msra.mxu0 %v3582_v3  ;;  %v2969_v3 = vsel %vm1446_vm7, 1.0, %v4070_v32  ;;  %vm1649_vm1 = vcmask 261120   ;;  %vm1677_vm2 = vcmask 523264   ;;  %vm1754_vm6 = vsmask.f32 256  ;;  %p3892_p7 = scmp.ne.s32.totalorder %s5153_s13, %s3891_s0  ;;  %p5370_p12 = scmp.ne.s32.totalorder %s5325_s29, 0 }
 0x18d   : > { %3194 = vmatprep.subr.bf16.mxu0 %v3583_v5  ;;  %vm1850_vm7 = vcmask 785408   ;;  %s4074_s9 = smov [#allocation17]  }
 0x18e   : > { %s3047_s16 = sshll.u32 %s5368_s19, 5  ;;  %p3893_p13 = pnand %p3892_p7, %p5370_p12 }
 0x18f   : > { %s3895_s23 = sshll.u32 %s4074_s9, 4  ;;  %s3896_s23 = int_to_ptr.vmem [resolvable:$false] %s3895_s23 }
 0x190   : > { %3195 = vmatpush3.bf16.msra.mxu0 %v3583_v5  ;;  %p3894_p1 = pneg %p3893_p13  ;;  %s3897_s4 = scalar_lea.vmem %s3896_s23, 2048 }
 0x191   : > { %3196 = vmatprep.subr.bf16.mxu0 %v3584_v6  ;;  %p3898_p5 = scmp.lt.s32.totalorder %s5153_s13, %s3896_s23  ;;  %p3899_p10 = scmp.lt.s32.totalorder %s3897_s4, %s3891_s0 }
 0x193   : > { %p3900_p0 = por %p3899_p10, %p3898_p5 }
 0x194   : > { %3197 = vmatpush3.bf16.msra.mxu0 %v3584_v6 }
 0x195   : > { %3198 = vmatprep.subr.bf16.mxu0 %v3585_v7  ;;  %p3901_p2 = pnand %p3900_p0, %p3894_p1 }
 0x198   : > { %3199 = vmatpush3.bf16.msra.mxu0 %v3585_v7  ;;  %v4707_v7 = vpack.c.bf16 %v4071_v50, %v2965_v59 }
 0x199   : > { %3200 = vmatprep.subr.bf16.mxu0 %v3586_v8 }
 0x19c   : > { %3201 = vmatpush3.bf16.msra.mxu0 %v3586_v8 }
 0x19d   : > { %3222 = vmatprep.subr.bf16.mxu0 %v3597_v18 }
 0x19f   : > { %3203 = vmatmul.mubr.bf16.vlgmr.msra.gmra.mrb[0].mxu0 %v571_v9 }
 0x1a0   : > { %3206 = vmatprep.mubr.bf16.mxu0 %v573_v10  ;;  %3223 = vmatpush3.bf16.msra.mxu0 %v3597_v18 }
 0x1a7   : > { %3207 = vmatmul.mubr.bf16.gmra.mrb[4].mxu0 %v575_v11  ;;  %v4713_v11 = vpack.c.bf16 %v4071_v50, %v2967_v62 }
 0x1a8   : > { %3210 = vmatprep.mubr.bf16.mxu0 %v577_v12  ;;  %v4716_v12 = vpack.c.bf16 %v4071_v50, %v2968_v63 }
 0x1af   : > { %3211 = vmatmul.mubr.bf16.gmra.mrb[8].mxu0 %v579_v13 }
 0x1b0   : > { %3214 = vmatprep.mubr.bf16.mxu0 %v581_v14 }
 0x1b7   : > { %3215 = vmatmul.mubr.bf16.gmra.mrb[12].mxu0 %v583_v15  ;;  %v952_v15 = vstv %s4696_s10 }
 0x1b8   : > { %3218 = vmatprep.mubr.bf16.mxu0 %v585_v16  ;;  %v2970_v16 = vsel %vm1448_vm9, 1.0, %v4070_v32  ;;  %vm4733_vm11 = vcmp.eq.s32.totalorder %v952_v15, 1 }
 0x1b9   : > { %v4742_v40 = vpack.c.bf16 %v4071_v50, %v2970_v16  ;;  %v3599_v16 = vld [vmem:[#allocation10 + $0x40] sm:$0xff]  }
 0x1bf   : > { %3219 = vmatmul.mubr.bf16.gmra.mrb[16].mxu0 %v3596_v17  ;;  %v4722_v17 = vpack.c.bf16 %v4071_v50, %v2969_v3 }
 0x272   : > { %v3204_v36 = vpop.f32.mrb[0].mxu0 }
 0x273   : > { %v765_v41 = vadd.f32 %v3204_v36, %v4672_v30  ;;  %v756_v42 = vpop.f32.mrb[1].mxu0 }
 0x274   : > { %v757_v44 = vadd.f32 %v4672_v30, %v756_v42  ;;  %v3205_v45 = vpop.f32.mrb[2].mxu0 }
 0x275   : > { %v768_v47 = vadd.f32 %v3205_v45, %v4672_v30  ;;  %v759_v48 = vpop.f32.mrb[3].mxu0  ;;  %v837_v54 = vmax.f32 %v765_v41, 0.0 }
 0x276   : > { %v760_v52 = vadd.f32 %v4672_v30, %v759_v48  ;;  %v835_v57 = vmax.f32 %v757_v44, 0.0 }
 0x277   : > { %v838_v55 = vmax.f32 %v768_v47, 0.0 }
 0x278   : > { %v836_v58 = vmax.f32 %v760_v52, 0.0  ;;  %v4764_v52 = vsel %vm4733_vm11, 1.0, %v4070_v32 }
 0x279   : > { %v856_v61 = vpack.c.bf16 %v838_v55, %v837_v54  ;;  %v3598_v54 = vld [vmem:[#allocation10 + $0x38] sm:$0xff]  }
 0x27a   : > { %v855_v0 = vpack.c.bf16 %v836_v58, %v835_v57  ;;  %v3208_v1 = vpop.f32.mrb[4].mxu0  ;;  %v1188_v58 = vand.u32 15, %v884_v21  ;;  %3327 = vmatprep.subr.bf16.mxu1 %v3598_v54  ;;  %3224 = vmatprep.subr.bf16.mxu0 %v3598_v54 }
 0x27b   : > { %v4703_v4 = vmul.bf16 1.0|1.0, %v856_v61  ;;  %v781_v5 = vadd.f32 %v3208_v1, %v4672_v30  ;;  %v772_v6 = vpop.f32.mrb[5].mxu0  ;;  %3333 = vmatpush3.bf16.msra.mxu1 %v3598_v54  ;;  %3225 = vmatpush3.bf16.msra.mxu0 %v3598_v54 }
 0x27c   : > { %v4709_v8 = vmul.bf16 %v1034_v46, %v855_v0  ;;  %v773_v9 = vadd.f32 %v4672_v30, %v772_v6  ;;  %v3209_v10 = vpop.f32.mrb[6].mxu0  ;;  %v4751_v46 = vadd.s32 160, %v4663_v19  ;;  %vm4786_vm12 = vcmp.ne.s32.totalorder %v1188_v58, 0  ;;  %3328 = vmatprep.subr.bf16.mxu1 %v3599_v16  ;;  %3226 = vmatprep.subr.bf16.mxu0 %v3599_v16 }
 0x27d   : > { %v784_v13 = vadd.f32 %v3209_v10, %v4672_v30  ;;  %v775_v14 = vpop.f32.mrb[7].mxu0  ;;  %v1531_v22 = vshll.u32 %v4703_v4, 16  ;;  %v841_v24 = vmax.f32 %v781_v5, 0.0  ;;  %v1512_v27 = vmul.bf16 %v1501_v51, %v4703_v4 }
 0x27e   : > { %v776_v20 = vadd.f32 %v4672_v30, %v775_v14  ;;  %v1524_v23 = vshll.u32 %v4709_v8, 16  ;;  %v1511_v26 = vmul.bf16 %v1500_v60, %v4709_v8  ;;  %v839_v28 = vmax.f32 %v773_v9, 0.0 }
 0x27f   : > { %v842_v25 = vmax.f32 %v784_v13, 0.0  ;;  %v1527_v33 = vshrl.u32 %v4709_v8, 16  ;;  %v4739_v37 = vrot.slane %v1512_v27, 1  ;;  %v4744_v41 = vrot.slane %v1531_v22, 1  ;;  %3334 = vmatpush3.bf16.msra.mxu1 %v3599_v16  ;;  %3227 = vmatpush3.bf16.msra.mxu0 %v3599_v16 }
 0x280   : > { %v840_v29 = vmax.f32 %v776_v20, 0.0  ;;  %v4730_v31 = vrot.slane %v1524_v23, 1  ;;  %v4737_v36 = vrot.slane %v1511_v26, 1  ;;  %v1535_v59 = vshrl.u32 %v4703_v4, 16 }
 0x281   : > { %v858_v34 = vpack.c.bf16 %v842_v25, %v841_v24  ;;  %v1202_v14 = vand.u32 15, %v4751_v46  ;;  %v1043_v58 = vpack.c.bf16 %v4764_v52, %v4764_v52 }
 0x282   : > { %v857_v38 = vpack.c.bf16 %v840_v29, %v839_v28  ;;  %v3212_v39 = vpop.f32.mrb[8].mxu0  ;;  %v1529_v42 = vor.u32 %v1527_v33, %v4730_v31  ;;  %v4756_v47 = vsel %vm1613_vm8, %v4737_v36, %v4739_v37  ;;  %v1537_v15 = vor.u32 %v1535_v59, %v4744_v41 }
 0x283   : > { %v4747_v43 = vmul.bf16 1.0|1.0, %v858_v34  ;;  %v797_v44 = vadd.f32 %v3212_v39, %v4672_v30  ;;  %v788_v45 = vpop.f32.mrb[9].mxu0  ;;  %v3600_v39 = vld [vmem:[#allocation10 + $0x48] sm:$0xff]   ;;  %vm4833_vm13 = vcmp.ne.s32.totalorder %v1202_v14, 0 }
 0x284   : > { %v4758_v48 = vmul.bf16 1.0|1.0, %v857_v38  ;;  %v789_v49 = vadd.f32 %v4672_v30, %v788_v45  ;;  %v3213_v51 = vpop.f32.mrb[10].mxu0  ;;  %v4768_v53 = vsel %vm1522_vm10, %v1529_v42, %v4744_v41  ;;  %3329 = vmatprep.subr.bf16.mxu1 %v3600_v39  ;;  %3228 = vmatprep.subr.bf16.mxu0 %v3600_v39 }
 0x285   : > { %v800_v55 = vadd.f32 %v3213_v51, %v4672_v30  ;;  %v791_v56 = vpop.f32.mrb[11].mxu0  ;;  %v1514_v57 = vmul.bf16 %v4700_v2, %v4747_v43  ;;  %v1547_v63 = vshll.u32 %v4747_v43, 16  ;;  %v845_v0 = vmax.f32 %v797_v44, 0.0  ;;  %3335 = vmatpush3.bf16.msra.mxu1 %v3600_v39  ;;  %3229 = vmatpush3.bf16.msra.mxu0 %v3600_v39 }
 0x286   : > { %v792_v60 = vadd.f32 %v4672_v30, %v791_v56  ;;  %v1513_v61 = vmul.bf16 %v4707_v7, %v4758_v48  ;;  %v1539_v62 = vshll.u32 %v4758_v48, 16  ;;  %v843_v1 = vmax.f32 %v789_v49, 0.0 }
 0x287   : > { %v846_v3 = vmax.f32 %v800_v55, 0.0  ;;  %v4779_v5 = vrot.slane %v1514_v57, 1  ;;  %v1543_v7 = vshrl.u32 %v4758_v48, 16  ;;  %v1549_v23 = vrot.slane %v1547_v63, 1 }
 0x288   : > { %v844_v2 = vmax.f32 %v792_v60, 0.0  ;;  %v4781_v6 = vrot.slane %v1513_v61, 1  ;;  %v4783_v9 = vrot.slane %v1539_v62, 1  ;;  %v1551_v46 = vshrl.u32 %v4747_v43, 16 }
 0x289   : > { %v860_v10 = vpack.c.bf16 %v846_v3, %v845_v0 }
 0x28a   : > { %v859_v18 = vpack.c.bf16 %v844_v2, %v843_v1  ;;  %v3216_v20 = vpop.f32.mrb[12].mxu0  ;;  %v1620_v21 = vsel %vm1613_vm8, %v4781_v6, %v4779_v5  ;;  %v1545_v22 = vor.u32 %v1543_v7, %v4783_v9  ;;  %v4802_v27 = vsel %vm1522_vm10, %v1537_v15, %v4783_v9  ;;  %v3601_v2 = vld [vmem:[#allocation10 + $0x50] sm:$0xff]  }
 0x28b   : > { %v4796_v24 = vmul.bf16 1.0|1.0, %v860_v10  ;;  %v813_v25 = vadd.f32 %v3216_v20, %v4672_v30  ;;  %v804_v26 = vpop.f32.mrb[13].mxu0  ;;  %1637 = vrot.lane.b32.xlu1 %v1620_v21, %s4072_s24  ;;  %v3574_v28 = vpack.i.bf16 %v4783_v9, %v4744_v41  ;;  %v4813_v38 = vsel %vm1613_vm8, %v4739_v37, %v4781_v6  ;;  %3330 = vmatprep.subr.bf16.mxu1 %v3601_v2 }
 0x28c   : > { %v4806_v29 = vmul.bf16 1.0|1.0, %v859_v18  ;;  %v805_v33 = vadd.f32 %v4672_v30, %v804_v26  ;;  %v3217_v34 = vpop.f32.mrb[14].mxu0  ;;  %v1550_v35 = vsel %vm1522_vm10, %v1545_v22, %v1549_v23  ;;  %v1553_v61 = vor.u32 %v1551_v46, %v1549_v23  ;;  %3230 = vmatprep.subr.bf16.mxu0 %v3601_v2  ;;  %3336 = vmatpush3.bf16.msra.mxu1 %v3601_v2 }
 0x28d   : > { %v849_v42 = vmax.f32 %v813_v25, 0.0  ;;  %v816_v44 = vadd.f32 %v3217_v34, %v4672_v30  ;;  %v807_v45 = vpop.f32.mrb[15].mxu0  ;;  %v1516_v49 = vmul.bf16 %v4716_v12, %v4796_v24  ;;  %v1563_v12 = vshll.u32 %v4796_v24, 16  ;;  %3231 = vmatpush3.bf16.msra.mxu0 %v3601_v2 }
 0x28e   : > { %v847_v51 = vmax.f32 %v805_v33, 0.0  ;;  %v808_v54 = vadd.f32 %v4672_v30, %v807_v45  ;;  %v1555_v55 = vshll.u32 %v4806_v29, 16  ;;  %v1515_v56 = vmul.bf16 %v4713_v11, %v4806_v29  ;;  %v3602_v45 = vld [vmem:[#allocation10 + $0x58] sm:$0xff]  }
 0x28f   : > { %v850_v57 = vmax.f32 %v816_v44, 0.0  ;;  %1592 = vrot.lane.b32.xlu1 %v1550_v35, %s4073_s12  ;;  %v4826_v59 = vrot.slane %v1516_v49, 1  ;;  %v1559_v11 = vshrl.u32 %v4806_v29, 16  ;;  %v2971_v1 = vsel %vm4786_vm12, 1.0, %v4070_v32  ;;  %3331 = vmatprep.subr.bf16.mxu1 %v3602_v45 }
 0x290   : > { %v848_v60 = vmax.f32 %v808_v54, 0.0  ;;  %v1557_v62 = vrot.slane %v1555_v55, 1  ;;  %v1621_v63 = vrot.slane %v1515_v56, 1  ;;  %v1565_v22 = vrot.slane %v1563_v12, 1  ;;  %3232 = vmatprep.subr.bf16.mxu0 %v3602_v45  ;;  %3337 = vmatpush3.bf16.msra.mxu1 %v3602_v45 }
 0x291   : > { %v862_v0 = vpack.c.bf16 %v850_v57, %v849_v42  ;;  %v2972_v33 = vsel %vm4833_vm13, 1.0, %v4070_v32  ;;  %3233 = vmatpush3.bf16.msra.mxu0 %v3602_v45  ;;  %v1056_v45 = vadd.s32 176, %v4663_v19 }
 0x292   : > { %v861_v7 = vpack.c.bf16 %v848_v60, %v847_v51  ;;  %v3220_v10 = vpop.f32.mrb[16].mxu0  ;;  %v1558_v15 = vsel %vm1522_vm10, %v1553_v61, %v1557_v62  ;;  %v1622_v16 = vsel %vm1613_vm8, %v4779_v5, %v1621_v63  ;;  %v1624_v18 = vsel %vm1613_vm8, %v1621_v63, %v4826_v59 }
 0x293   : > { %v4842_v20 = vmul.bf16 1.0|1.0, %v862_v0  ;;  %v829_v13 = vadd.f32 %v3220_v10, %v4672_v30  ;;  %v820_v14 = vpop.f32.mrb[17].mxu0  ;;  %1594 = vrot.lane.b32.xlu0 %v1558_v15, %s4073_s12  ;;  %1639 = vrot.lane.b32.xlu1 %v1622_v16, %s4072_s24  ;;  %v1561_v21 = vor.u32 %v1559_v11, %v1557_v62  ;;  %v1567_v5 = vshrl.u32 %v4796_v24, 16  ;;  %v4878_v15 = vld [vmem:[#allocation10] sm:$0xff]  }
 0x294   : > { %v4847_v23 = vmul.bf16 1.0|1.0, %v861_v7  ;;  %v821_v25 = vadd.f32 %v4672_v30, %v820_v14  ;;  %v3221_v26 = vpop.f32.mrb[18].mxu0  ;;  %v1509_v0 = vpack.c.bf16 %v4071_v50, %v2972_v33  ;;  %3250 = vmatprep.subr.bf16.mxu1 %v4878_v15 }
 0x295   : > { %v853_v34 = vmax.f32 %v829_v13, 0.0  ;;  %v832_v35 = vadd.f32 %v3221_v26, %v4672_v30  ;;  %v823_v39 = vpop.f32.mrb[19].mxu0  ;;  %v1566_v42 = vsel %vm1522_vm10, %v1561_v21, %v1565_v22  ;;  %v1518_v44 = vmul.bf16 %v4742_v40, %v4842_v20 }
 0x296   : > { %v851_v46 = vmax.f32 %v821_v25, 0.0  ;;  %v824_v49 = vadd.f32 %v4672_v30, %v823_v39  ;;  %v1517_v51 = vmul.bf16 %v4722_v17, %v4847_v23  ;;  %v1571_v54 = vshll.u32 %v4847_v23, 16 }
 0x297   : > { %v854_v55 = vmax.f32 %v832_v35, 0.0  ;;  %1641 = vrot.lane.b32.xlu0 %v1624_v18, %s4072_s24  ;;  %v1627_v56 = vrot.slane %v1518_v44, 1  ;;  %v1575_v57 = vshrl.u32 %v4847_v23, 16  ;;  %v1579_v12 = vshll.u32 %v4842_v20, 16 }
 0x298   : > { %v852_v40 = vmax.f32 %v824_v49, 0.0  ;;  %v1625_v60 = vrot.slane %v1517_v51, 1  ;;  %v1569_v61 = vor.u32 %v1567_v5, %v1565_v22  ;;  %v1573_v62 = vrot.slane %v1571_v54, 1 }
 0x299   : > { %v864_v30 = vpack.c.bf16 %v854_v55, %v853_v34  ;;  %v1581_v63 = vrot.slane %v1579_v12, 1  ;;  %v1508_v17 = vpack.c.bf16 %v4071_v50, %v2971_v1  ;;  %v1583_v13 = vshrl.u32 %v4842_v20, 16 }
 0x29a   : > { %v863_v11 = vpack.c.bf16 %v852_v40, %v851_v46  ;;  %v1628_v3 = vsel %vm1613_vm8, %v1625_v60, %v1627_v56  ;;  %v1574_v2 = vsel %vm1522_vm10, %v1569_v61, %v1573_v62  ;;  %v1577_v7 = vor.u32 %v1575_v57, %v1573_v62 }
 0x29b   : > { %v4872_v10 = vmul.bf16 %v1043_v58, %v864_v30  ;;  %1596 = vrot.lane.b32.xlu0 %v1566_v42, %s4073_s12  ;;  %1645 = vrot.lane.b32.xlu1 %v1628_v3, %s4072_s24  ;;  %v1626_v1 = vsel %vm1613_vm8, %v4826_v59, %v1625_v60  ;;  %v1585_v26 = vor.u32 %v1583_v13, %v1581_v63  ;;  %v1216_v46 = vand.u32 15, %v1056_v45 }
 0x29c   : > { %v4880_v16 = vmul.bf16 1.0|1.0, %v863_v11  ;;  %v1582_v18 = vsel %vm1522_vm10, %v1577_v7, %v1581_v63  ;;  %v877_v54 = vadd.s32 88, %v4663_v19  ;;  %v881_v57 = vadd.s32 120, %v4663_v19 }
 0x29d   : > { %v1520_v14 = vmul.bf16 %v1509_v0, %v4872_v10  ;;  %v2133_v52 = vshll.u32 %v4872_v10, 16  ;;  %vm1454_vm14 = vcmp.ne.s32.totalorder %v1216_v46, 0  ;;  %v879_v40 = vadd.s32 104, %v4663_v19 }
 0x29e   : > { %v1519_v58 = vmul.bf16 %v1508_v17, %v4880_v16  ;;  %v1709_v21 = vshll.u32 %v4880_v16, 16  ;;  %v1713_v59 = vshrl.u32 %v4880_v16, 16  ;;  %v1139_v12 = vand.u32 15, %v877_v54 }
 0x29f   : > { %1598 = vrot.lane.b32.xlu0 %v1574_v2, %s4073_s12  ;;  %1600 = vrot.lane.b32.xlu1 %v1582_v18, %s4073_s12  ;;  %v1723_v22 = vrot.slane %v1520_v14, 1  ;;  %v2135_v33 = vrot.slane %v2133_v52, 1  ;;  %v1167_v30 = vand.u32 15, %v881_v57  ;;  %v1153_v17 = vand.u32 15, %v879_v40 }
 0x2a0   : > { %v1629_v25 = vrot.slane %v1519_v58, 1  ;;  %v1711_v5 = vrot.slane %v1709_v21, 1  ;;  %vm1357_vm3 = vcmp.ne.s32.totalorder %v1139_v12, 15 }
 0x2a1   : > { %v2957_v7 = vsel %vm1357_vm3, 1.0, %v4070_v32  ;;  %vm1361_vm4 = vcmp.ne.s32.totalorder %v1167_v30, 15  ;;  %vm1359_vm5 = vcmp.ne.s32.totalorder %v1153_v17, 15 }
 0x2a2   : > { %v1630_v34 = vsel %vm1613_vm8, %v1627_v56, %v1629_v25  ;;  %v1712_v35 = vsel %vm1522_vm10, %v1585_v26, %v1711_v5  ;;  %v1724_v39 = vsel %vm1613_vm8, %v1629_v25, %v1723_v22  ;;  %v1715_v42 = vor.u32 %v1713_v59, %v1711_v5 }
 0x2a3   : > { %1643 = vrot.lane.b32.xlu0 %v1626_v1, %s4072_s24  ;;  %1647 = vrot.lane.b32.xlu1 %v1630_v34, %s4072_s24  ;;  %v883_v1 = vadd.s32 136, %v4663_v19  ;;  %v2959_v52 = vsel %vm1361_vm4, 1.0, %v4070_v32  ;;  %v885_v25 = vadd.s32 152, %v4663_v19 }
 0x2a4   : > { %v2136_v44 = vsel %vm1522_vm10, %v1715_v42, %v2135_v33  ;;  %v1419_v5 = vpack.c.bf16 %v2959_v52, %v4071_v50  ;;  %v3605_v52 = vld [vmem:[#allocation10 + $0x10] sm:$0xff]  }
 0x2a5   : > { %v1195_v46 = vand.u32 15, %v885_v25 }
 0x2a7   : > { %1718 = vrot.lane.b32.xlu0 %v1712_v35, %s4073_s12  ;;  %1727 = vrot.lane.b32.xlu1 %v1724_v39, %s4072_s24  ;;  %vm1365_vm9 = vcmp.ne.s32.totalorder %v1195_v46, 15 }
 0x2ab   : > { %1720 = vrot.lane.b32.xlu0 %v1715_v42, %s4073_s12  ;;  %1590 = vrot.lane.b32.xlu1 %v4802_v27, %s4073_s12 }
 0x2af   : > { %1586 = vrot.lane.b32.xlu1 %v4730_v31, %s4073_s12  ;;  %1588 = vrot.lane.b32.xlu0 %v4768_v53, %s4073_s12  ;;  %v2973_v31 = vsel %vm1454_vm14, 1.0, %v4070_v32  ;;  %v2137_v53 = vshrl.u32 %v4872_v10, 16 }
 0x2b0   : > { %v1510_v27 = vpack.c.bf16 %v4071_v50, %v2973_v31 }
 0x2b3   : > { %1631 = vrot.lane.b32.xlu1 %v4737_v36, %s4072_s24  ;;  %1633 = vrot.lane.b32.xlu0 %v4756_v47, %s4072_s24  ;;  %v2139_v36 = vor.u32 %v2137_v53, %v2135_v33  ;;  %v1521_v47 = vmul.bf16 0, %v1510_v27 }
 0x2b5   : > { %v2147_v41 = vrot.slane %v1521_v47, 1 }
 0x2b7   : > { %3575 = vrot.lane.b32.xlu1 %v3574_v28, %s4073_s12  ;;  %1635 = vrot.lane.b32.xlu0 %v4813_v38, %s4072_s24  ;;  %v2148_v9 = vsel %vm1613_vm8, %v1723_v22, %v2147_v41  ;;  %v873_v28 = vadd.s32 56, %v4663_v19  ;;  %v1181_v22 = vand.u32 15, %v883_v1 }
 0x2b9   : > { %v1111_v38 = vand.u32 15, %v873_v28  ;;  %vm1363_vm8 = vcmp.ne.s32.totalorder %v1181_v22, 15  ;;  %v869_v28 = vadd.s32 24, %v4663_v19 }
 0x2bb   : > { %2149 = vrot.lane.b32.xlu1 %v4781_v6, %s4072_s24  ;;  %1602 = vrot.lane.b32.xlu0 %v1585_v26, %s4073_s12  ;;  %v875_v6 = vadd.s32 72, %v4663_v19  ;;  %vm1353_vm15 = vcmp.ne.s32.totalorder %v1111_v38, 15  ;;  %v2958_v26 = vsel %vm1359_vm5, 1.0, %v4070_v32  ;;  %v1083_v30 = vand.u32 15, %v869_v28  ;;  %v3607_v28 = vld [vmem:[#allocation10 + $0x20] sm:$0xff]  }
 0x2bc   : > { %v2955_v51 = vsel %vm1353_vm15, 1.0, %v4070_v32  ;;  %v1418_v53 = vpack.c.bf16 %v2958_v26, %v4071_v50 }
 0x2bd   : > { %v1125_v49 = vand.u32 15, %v875_v6  ;;  %vm1349_vm11 = vcmp.ne.s32.totalorder %v1083_v30, 15 }
 0x2be   : > { %v2953_v26 = vsel %vm1349_vm11, 1.0, %v4070_v32 }
 0x2bf   : > { %2144 = vrot.lane.b32.xlu1 %v2139_v36, %s4073_s12  ;;  %1725 = vrot.lane.b32.xlu0 %v4739_v37, %s4072_s24  ;;  %vm1355_vm0 = vcmp.ne.s32.totalorder %v1125_v49, 15  ;;  %v1415_v37 = vpack.c.bf16 %v2955_v51, %v4071_v50  ;;  %v1430_v36 = vmul.bf16 %v1419_v5, %v4847_v23  ;;  %v1429_v51 = vmul.bf16 %v1418_v53, %v4796_v24 }
 0x2c0   : > { %v2956_v56 = vsel %vm1355_vm0, 1.0, %v4070_v32  ;;  %v1413_v53 = vpack.c.bf16 %v2953_v26, %v4071_v50 }
 0x2c1   : > { %v1426_v60 = vmul.bf16 %v1415_v37, %v4758_v48  ;;  %v1416_v61 = vpack.c.bf16 %v2956_v56, %v4071_v50 }
 0x2c3   : > { %2142 = vrot.lane.b32.xlu0 %v2136_v44, %s4073_s12  ;;  %v1427_v0 = vmul.bf16 %v1416_v61, %v4747_v43  ;;  %v1417_v43 = vpack.c.bf16 %v2957_v7, %v4071_v50  ;;  %v871_v61 = vadd.s32 40, %v4663_v19 }
 0x2c5   : > { %v1428_v35 = vmul.bf16 %v1417_v43, %v4806_v29  ;;  %v867_v29 = vadd.s32 8, %v4663_v19  ;;  %v1097_v43 = vand.u32 15, %v871_v61 }
 0x2c7   : > { %2151 = vrot.lane.b32.xlu0 %v2148_v9, %s4072_s24  ;;  %v2960_v9 = vsel %vm1363_vm8, 1.0, %v4070_v32  ;;  %v1069_v37 = vand.u32 15, %v867_v29  ;;  %vm1351_vm12 = vcmp.ne.s32.totalorder %v1097_v43, 15 }
 0x2c8   : > { %v1420_v23 = vpack.c.bf16 %v2960_v9, %v4071_v50 }
 0x2c9   : > { %vm1347_vm10 = vcmp.ne.s32.totalorder %v1069_v37, 15 }
 0x2ca   : > { %v4990_v7 = vmul.bf16 %v1420_v23, %v4842_v20 }
 0x2fd   : > { %v1638_v55 = vpop.permute.xlu1 %1637 }
 0x301   : > { %v1593_v62 = vpop.permute.xlu1 %1592 }
 0x302   : > { %v1661_v63 = vsel %vm1649_vm1, %v1426_v60, %v1593_v62  ;;  %v2961_v60 = vsel %vm1365_vm9, 1.0, %v4070_v32  ;;  %v3604_v62 = vld [vmem:[#allocation10 + $0x8] sm:$0xff]  }
 0x303   : > { %v4943_v11 = vsel %vm1677_vm2, %v1661_v63, %v1638_v55 }
 0x304   : > { %v1765_v13 = vshrl.u32 %v4943_v11, 16  ;;  %v1768_v43 = vshll.u32 %v4943_v11, 16 }
 0x305   : > { %v1595_v3 = vpop.permute.xlu0 %1594  ;;  %v1640_v2 = vpop.permute.xlu1 %1639 }
 0x306   : > { %v1664_v48 = vsel %vm1649_vm1, %v1427_v0, %v1595_v3  ;;  %v4955_v33 = vrot.slane %v1765_v13, 7 }
 0x307   : > { %v1687_v18 = vsel %vm1677_vm2, %v1664_v48, %v1640_v2  ;;  %v1421_v48 = vpack.c.bf16 %v2961_v60, %v4071_v50  ;;  %v3608_v60 = vld [vmem:[#allocation10 + $0x28] sm:$0xff]  }
 0x308   : > { %v1772_v14 = vshrl.u32 %v1687_v18, 16  ;;  %v1775_v59 = vshll.u32 %v1687_v18, 16 }
 0x309   : > { %v1642_v58 = vpop.permute.xlu0 %1641  ;;  %v5005_v25 = vmul.bf16 %v1421_v48, %v4880_v16 }
 0x30a   : > { %v1774_v21 = vrot.slane %v1772_v14, 7 }
 0x30c   : > { %v1777_v34 = vor.u32 %v1775_v59, %v1774_v21 }
 0x30d   : > { %v1597_v39 = vpop.permute.xlu0 %1596  ;;  %v1646_v42 = vpop.permute.xlu1 %1645 }
 0x30e   : > { %v1667_v44 = vsel %vm1649_vm1, %v1428_v35, %v1597_v39  ;;  %v4961_v45 = vsel %vm1754_vm6, %v4955_v33, %v1777_v34 }
 0x30f   : > { %v1689_v31 = vsel %vm1677_vm2, %v1667_v44, %v1642_v58  ;;  %3238 = vmatprep.mubr.msk.bf16.mxu1 %vm1850_vm7, %v4961_v45 }
 0x310   : > { %v1779_v27 = vshrl.u32 %v1689_v31, 16  ;;  %v1782_v6 = vshll.u32 %v1689_v31, 16 }
 0x311   : > { %v1599_v47 = vpop.permute.xlu0 %1598  ;;  %v1601_v41 = vpop.permute.xlu1 %1600 }
 0x312   : > { %v1781_v38 = vrot.slane %v1779_v27, 7  ;;  %v1673_v49 = vsel %vm1649_vm1, %v1430_v36, %v1601_v41  ;;  %v1670_v57 = vsel %vm1649_vm1, %v1429_v51, %v1599_v47  ;;  %v2954_v36 = vsel %vm1351_vm12, 1.0, %v4070_v32 }
 0x313   : > { %v1693_v54 = vsel %vm1677_vm2, %v1673_v49, %v1646_v42  ;;  %v3606_v42 = vld [vmem:[#allocation10 + $0x18] sm:$0xff]   ;;  %v1414_v51 = vpack.c.bf16 %v2954_v36, %v4071_v50 }
 0x314   : > { %v1784_v55 = vor.u32 %v1782_v6, %v1781_v38  ;;  %v1793_v56 = vshrl.u32 %v1693_v54, 16  ;;  %v1796_v24 = vshll.u32 %v1693_v54, 16  ;;  %v1424_v54 = vmul.bf16 %v1413_v53, %v4709_v8 }
 0x315   : > { %v1644_v12 = vpop.permute.xlu0 %1643  ;;  %v4976_v40 = vpop.permute.xlu1 %1647  ;;  %v1425_v30 = vmul.bf16 %v1414_v51, %v4703_v4 }
 0x316   : > { %v4980_v63 = vrot.slane %v1793_v56, 7  ;;  %v1691_v17 = vsel %vm1677_vm2, %v1670_v57, %v1644_v12  ;;  %v4984_v0 = vsel %vm1754_vm6, %v1774_v21, %v1784_v55  ;;  %v2952_v21 = vsel %vm1347_vm10, 1.0, %v4070_v32 }
 0x317   : > { %v1786_v3 = vshrl.u32 %v1691_v17, 16  ;;  %3239 = vmatmul.mubr.msk.bf16.vlgmr.msra.gmra.mrb[0].mxu1 %vm1850_vm7, %v4984_v0  ;;  %v1789_v18 = vshll.u32 %v1691_v17, 16  ;;  %v1412_v39 = vpack.c.bf16 %v2952_v21, %v4071_v50  ;;  %v1055_v55 = vadd.s32 168, %v4663_v19 }
 0x318   : > { %v1798_v2 = vor.u32 %v1796_v24, %v4980_v63  ;;  %3251 = vmatpush3.bf16.msra.mxu1 %v4878_v15 }
 0x319   : > { %v1788_v1 = vrot.slane %v1786_v3, 7  ;;  %v1719_v13 = vpop.permute.xlu0 %1718  ;;  %v4994_v14 = vpop.permute.xlu1 %1727  ;;  %3252 = vmatprep.subr.bf16.mxu1 %v3604_v62  ;;  %v1423_v47 = vmul.bf16 0, %v1412_v39  ;;  %v1209_v19 = vand.u32 15, %v1055_v55 }
 0x31a   : > { %v1732_v58 = vsel %vm1649_vm1, %v4990_v7, %v1719_v13  ;;  %v3609_v13 = vld [vmem:[#allocation10 + $0x60] sm:$0xff]  }
 0x31b   : > { %v1791_v20 = vor.u32 %v1789_v18, %v1788_v1  ;;  %v1738_v15 = vsel %vm1677_vm2, %v1732_v58, %v4976_v40  ;;  %v5002_v59 = vsel %vm1754_vm6, %v1788_v1, %v1798_v2  ;;  %vm5047_vm13 = vcmp.ne.s32.totalorder %v1209_v19, 15 }
 0x31c   : > { %v1800_v22 = vshrl.u32 %v1738_v15, 16  ;;  %3253 = vmatpush3.bf16.msra.mxu1 %v3604_v62  ;;  %v1803_v46 = vshll.u32 %v1738_v15, 16  ;;  %v1770_v15 = vor.u32 %v1768_v43, %v4955_v33  ;;  %v3614_v43 = vld [vmem:[#allocation10 + $0x88] sm:$0xff]  }
 0x31d   : > { %v1721_v5 = vpop.permute.xlu0 %1720  ;;  %v1591_v34 = vpop.permute.xlu1 %1590  ;;  %v5009_v35 = vsel %vm1754_vm6, %v1781_v38, %v1791_v20  ;;  %3254 = vmatprep.subr.bf16.mxu1 %v3605_v52 }
 0x31e   : > { %v5012_v44 = vrot.slane %v1800_v22, 7  ;;  %v1735_v16 = vsel %vm1649_vm1, %v5005_v25, %v1721_v5  ;;  %3242 = vmatprep.mubr.msk.bf16.mxu1 %vm1850_vm7, %v5009_v35  ;;  %v1658_v3 = vsel %vm1649_vm1, %v1425_v30, %v1591_v34 }
 0x31f   : > { %v1740_v31 = vsel %vm1677_vm2, %v1735_v16, %v4994_v14  ;;  %3243 = vmatmul.mubr.msk.bf16.gmra.mrb[4].mxu1 %vm1850_vm7, %v5002_v59 }
 0x320   : > { %v1805_v29 = vor.u32 %v1803_v46, %v5012_v44  ;;  %v1807_v27 = vshrl.u32 %v1740_v31, 16  ;;  %3255 = vmatpush3.bf16.msra.mxu1 %v3605_v52  ;;  %v1810_v6 = vshll.u32 %v1740_v31, 16 }
 0x321   : > { %v1587_v41 = vpop.permute.xlu1 %1586  ;;  %v1589_v9 = vpop.permute.xlu0 %1588  ;;  %3256 = vmatprep.subr.bf16.mxu1 %v3606_v42 }
 0x322   : > { %v1809_v38 = vrot.slane %v1807_v27, 7  ;;  %v5027_v49 = vsel %vm1754_vm6, %v4980_v63, %v1805_v29  ;;  %v1652_v56 = vsel %vm1649_vm1, %v1423_v47, %v1587_v41  ;;  %v1655_v23 = vsel %vm1649_vm1, %v1424_v54, %v1589_v9  ;;  %v3610_v41 = vld [vmem:[#allocation10 + $0x68] sm:$0xff]  }
 0x323   : > { %3246 = vmatprep.mubr.msk.bf16.mxu1 %vm1850_vm7, %v5027_v49  ;;  %v2962_v47 = vsel %vm5047_vm13, 1.0, %v4070_v32 }
 0x324   : > { %v1812_v37 = vor.u32 %v1810_v6, %v1809_v38  ;;  %3257 = vmatpush3.bf16.msra.mxu1 %v3606_v42 }
 0x325   : > { %v1632_v57 = vpop.permute.xlu1 %1631  ;;  %v1634_v12 = vpop.permute.xlu0 %1633  ;;  %3258 = vmatprep.subr.bf16.mxu1 %v3607_v28 }
 0x326   : > { %v1679_v61 = vsel %vm1677_vm2, %v1652_v56, %v1632_v57  ;;  %v1681_v62 = vsel %vm1677_vm2, %v1655_v23, %v1634_v12  ;;  %v1813_v8 = vsel %vm1754_vm6, %v5012_v44, %v1812_v37  ;;  %v3611_v23 = vld [vmem:[#allocation10 + $0x70] sm:$0xff]  }
 0x327   : > { %v1972_v24 = vshrl.u32 %v1679_v61, 16  ;;  %v1975_v17 = vshrl.u32 %v1681_v62, 16  ;;  %3247 = vmatmul.mubr.msk.bf16.gmra.mrb[8].mxu1 %vm1850_vm7, %v1813_v8  ;;  %v1978_v48 = vshll.u32 %v1681_v62, 16 }
 0x328   : > { %3259 = vmatpush3.bf16.msra.mxu1 %v3607_v28 }
 0x329   : > { %v1977_v2 = vrot.slane %v1975_v17, 7  ;;  %v3576_v1 = vpop.permute.xlu1 %3575  ;;  %v1636_v18 = vpop.permute.xlu0 %1635  ;;  %3260 = vmatprep.subr.bf16.mxu1 %v3608_v60  ;;  %v1974_v4 = vrot.slane %v1972_v24, 7  ;;  %v3612_v24 = vld [vmem:[#allocation10 + $0x78] sm:$0xff]  }
 0x32a   : > { %v3578_v52 = vunpack.i.h.bf16 %v3576_v1  ;;  %v1683_v58 = vsel %vm1677_vm2, %v1658_v3, %v1636_v18  ;;  %v3577_v5 = vunpack.i.l.bf16 %v3576_v1 }
 0x32b   : > { %v1980_v21 = vor.u32 %v1978_v48, %v1977_v2  ;;  %v1758_v20 = vshrl.u32 %v1683_v58, 16  ;;  %v1761_v39 = vshll.u32 %v1683_v58, 16 }
 0x32c   : > { %v2154_v22 = vsel %vm1649_vm1, %v1425_v30, %v3578_v52  ;;  %3261 = vmatpush3.bf16.msra.mxu1 %v3608_v60  ;;  %v1730_v38 = vsel %vm1649_vm1, %v1424_v54, %v3577_v5 }
 0x32d   : > { %v1760_v34 = vrot.slane %v1758_v20, 7  ;;  %v2150_v42 = vpop.permute.xlu1 %2149  ;;  %v1603_v11 = vpop.permute.xlu0 %1602  ;;  %v1981_v46 = vsel %vm1754_vm6, %v1974_v4, %v1980_v21  ;;  %3278 = vmatprep.subr.bf16.mxu1 %v3609_v13  ;;  %v3016_v20 = vld [vmem:[#allocation14] ss:$0 sm:$0xff] }
 0x32e   : > { %v2161_v16 = vsel %vm1677_vm2, %v2154_v22, %v2150_v42  ;;  %v1676_v33 = vsel %vm1649_vm1, %v4990_v7, %v1603_v11  ;;  %3262 = vmatprep.mubr.msk.bf16.mxu1 %vm1850_vm7, %v1981_v46 }
 0x32f   : > { %v1763_v31 = vor.u32 %v1761_v39, %v1760_v34  ;;  %v2178_v53 = vshrl.u32 %v2161_v16, 16  ;;  %v1695_v29 = vsel %vm1677_vm2, %v1676_v33, %v4976_v40  ;;  %v1771_v27 = vsel %vm1754_vm6, %v1760_v34, %v1770_v15 }
 0x330   : > { %v1983_v36 = vshrl.u32 %v1695_v29, 16  ;;  %v1986_v51 = vshll.u32 %v1695_v29, 16  ;;  %v1422_v40 = vpack.c.bf16 %v2962_v47, %v4071_v50 }
 0x331   : > { %v2180_v9 = vrot.slane %v2178_v53, 7  ;;  %v1726_v28 = vpop.permute.xlu0 %1725  ;;  %v1982_v7 = vsel %vm1754_vm6, %v1977_v2, %v1763_v31  ;;  %v2145_v12 = vpop.permute.xlu1 %2144  ;;  %v3613_v2 = vld [vmem:[#allocation10 + $0x80] sm:$0xff]  }
 0x332   : > { %v1985_v6 = vrot.slane %v1983_v36, 7  ;;  %v1737_v37 = vsel %vm1677_vm2, %v1730_v38, %v1726_v28  ;;  %3263 = vmatmul.mubr.msk.bf16.vlgmr.msra.gmra.mrb[12].mxu1 %vm1850_vm7, %v1982_v7  ;;  %v1433_v50 = vmul.bf16 %v1422_v40, %v4872_v10 }
 0x333   : > { %v1755_v55 = vshrl.u32 %v1737_v37, 16  ;;  %3279 = vmatpush3.bf16.msra.mxu1 %v3609_v13  ;;  %3266 = vmatprep.mubr.msk.bf16.mxu1 %vm1850_vm7, %v1771_v27  ;;  %v2181_v32 = vsel %vm1754_vm6, %v2180_v9, %v1770_v15 }
 0x334   : > { %v1988_v56 = vor.u32 %v1986_v51, %v1985_v6  ;;  %3280 = vmatprep.subr.bf16.mxu1 %v3610_v41  ;;  %v2159_v17 = vsel %vm1649_vm1, %v1433_v50, %v2145_v12 }
 0x335   : > { %v1757_v54 = vrot.slane %v1755_v55, 7  ;;  %v2143_v57 = vpop.permute.xlu0 %2142 }
 0x336   : > { %v2156_v60 = vsel %vm1649_vm1, %v5005_v25, %v2143_v57  ;;  %v1989_v61 = vsel %vm1754_vm6, %v4980_v63, %v1988_v56 }
 0x337   : > { %v2162_v62 = vsel %vm1677_vm2, %v2156_v60, %v4994_v14  ;;  %v1764_v8 = vsel %vm1754_vm6, %v1757_v54, %v1763_v31  ;;  %3281 = vmatpush3.bf16.msra.mxu1 %v3610_v41 }
 0x338   : > { %v2182_v30 = vshrl.u32 %v2162_v62, 16  ;;  %3234 = vmatprep.mubr.msk.bf16.mxu0 %vm1850_vm7, %v1764_v8  ;;  %3282 = vmatprep.subr.bf16.mxu1 %v3611_v23  ;;  %v2185_v63 = vshll.u32 %v2162_v62, 16 }
 0x339   : > { %v2152_v19 = vpop.permute.xlu0 %2151  ;;  %3235 = vmatmul.mubr.msk.bf16.vlgmr.msra.gmra.mrb[20].mxu0 %vm1850_vm7, %v1771_v27 }
 0x33a   : > { %v2184_v25 = vrot.slane %v2182_v30, 7  ;;  %v2164_v10 = vsel %vm1677_vm2, %v2159_v17, %v2152_v19  ;;  %3267 = vmatmul.mubr.msk.bf16.gmra.mrb[0].mxu1 %vm1850_vm7, %v4961_v45 }
 0x33b   : > { %v2189_v14 = vshrl.u32 %v2164_v10, 16  ;;  %3270 = vmatprep.mubr.msk.bf16.mxu1 %vm1850_vm7, %v4984_v0  ;;  %3283 = vmatpush3.bf16.msra.mxu1 %v3611_v23  ;;  %v2192_v1 = vshll.u32 %v2164_v10, 16 }
 0x33c   : > { %v2187_v3 = vor.u32 %v2185_v63, %v2184_v25  ;;  %3284 = vmatprep.subr.bf16.mxu1 %v3612_v24 }
 0x33d   : > { %v2191_v48 = vrot.slane %v2189_v14, 7 }
 0x33e   : > { %v2188_v18 = vsel %vm1754_vm6, %v5012_v44, %v2187_v3  ;;  %v3615_v44 = vld [vmem:[#allocation11] sm:$0xff]  }
 0x33f   : > { %v2194_v13 = vor.u32 %v2192_v1, %v2191_v48  ;;  %3285 = vmatpush3.bf16.msra.mxu1 %v3612_v24  ;;  %3306 = vmatprep.subr.bf16.mxu0 %v3615_v44 }
 0x340   : > { %3286 = vmatprep.subr.bf16.mxu1 %v3613_v2  ;;  %3307 = vmatpush3.bf16.msra.mxu0 %v3615_v44 }
 0x341   : > { %v2195_v52 = vsel %vm1754_vm6, %v2184_v25, %v2194_v13 }
 0x342   : > { %3271 = vmatmul.mubr.msk.bf16.gmra.mrb[4].mxu1 %vm1850_vm7, %v5009_v35 }
 0x343   : > { %3274 = vmatprep.mubr.msk.bf16.mxu1 %vm1850_vm7, %v5002_v59  ;;  %3287 = vmatpush3.bf16.msra.mxu1 %v3613_v2 }
 0x344   : > { %3288 = vmatprep.subr.bf16.mxu1 %v3614_v43 }
 0x347   : > { %3289 = vmatpush3.bf16.msra.mxu1 %v3614_v43 }
 0x34a   : > { %3275 = vmatmul.mubr.msk.bf16.gmra.mrb[8].mxu1 %vm1850_vm7, %v1989_v61 }
 0x34b   : > { %3290 = vmatprep.mubr.msk.bf16.mxu1 %vm1850_vm7, %v2181_v32 }
 0x352   : > { %3291 = vmatmul.mubr.msk.bf16.vlgmr.msra.gmra.mrb[12].mxu1 %vm1850_vm7, %v4961_v45  ;;  %v3616_v45 = vld [vmem:[#allocation11 + $0x8] sm:$0xff]  }
 0x353   : > { %3294 = vmatprep.mubr.msk.bf16.mxu1 %vm1850_vm7, %v4984_v0  ;;  %3308 = vmatprep.subr.bf16.mxu0 %v3616_v45 }
 0x354   : > { %3309 = vmatpush3.bf16.msra.mxu0 %v3616_v45 }
 0x35a   : > { %3295 = vmatmul.mubr.msk.bf16.gmra.mrb[0].mxu1 %vm1850_vm7, %v5009_v35 }
 0x35b   : > { %3298 = vmatprep.mubr.msk.bf16.mxu1 %vm1850_vm7, %v5002_v59 }
 0x362   : > { %3299 = vmatmul.mubr.msk.bf16.gmra.mrb[4].mxu1 %vm1850_vm7, %v5027_v49 }
 0x363   : > { %3302 = vmatprep.mubr.msk.bf16.mxu1 %vm1850_vm7, %v2188_v18 }
 0x36a   : > { %3303 = vmatmul.mubr.msk.bf16.gmra.mrb[8].mxu1 %vm1850_vm7, %v2195_v52 }
 0x40c   : > { %v3236_v0 = vpop.f32.mrb[20].mxu0 }
 0x40d   : > { %v1909_v58 = vpop.f32.mrb[21].mxu0 }
 0x40e   : > { %v3237_v4 = vpop.f32.mrb[22].mxu0 }
 0x40f   : > { %v1912_v35 = vpop.f32.mrb[23].mxu0 }
 0x425   : > { %v3292_v21 = vpop.f32.mrb[12].mxu1 }
 0x426   : > { %v3338_v59 = vadd.f32 %v3292_v21, %v3236_v0  ;;  %v2275_v15 = vpop.f32.mrb[13].mxu1 }
 0x427   : > { %v3339_v22 = vadd.f32 %v2275_v15, %v1909_v58  ;;  %v3293_v49 = vpop.f32.mrb[14].mxu1  ;;  %v5114_v58 = vld [vmem:[#allocation16] ss:$0 sm:$0xff] }
 0x428   : > { %v2363_v26 = vadd.f32 %v3338_v59, %v3016_v20  ;;  %v3340_v5 = vadd.f32 %v3293_v49, %v3237_v4  ;;  %v2278_v34 = vpop.f32.mrb[15].mxu1  ;;  %v3625_v4 = vld [vmem:[%s4620_s30 + $0x8] sm:$0xff]   ;;  %v3626_v59 = vld [vmem:[%s4620_s30] sm:$0xff]  }
 0x429   : > { %v2361_v39 = vadd.f32 %v3339_v22, %v3016_v20  ;;  %v3341_v42 = vadd.f32 %v2278_v34, %v1912_v35  ;;  %v2547_v35 = vunpack.c.l.bf16 %v3625_v4  ;;  %v2545_v15 = vunpack.c.l.bf16 %v3626_v59 }
 0x42a   : > { %v2364_v11 = vadd.f32 %v3340_v5, %v3016_v20  ;;  %v2379_v16 = vmax.f32 %v2363_v26, 0.0  ;;  %v2548_v49 = vunpack.c.h.bf16 %v3625_v4  ;;  %v2546_v34 = vunpack.c.h.bf16 %v3626_v59 }
 0x42b   : > { %v2362_v46 = vadd.f32 %v3341_v42, %v3016_v20  ;;  %v2377_v31 = vmax.f32 %v2361_v39, 0.0 }
 0x42c   : > { %v2380_v33 = vmax.f32 %v2364_v11, 0.0 }
 0x42d   : > { %v2378_v53 = vmax.f32 %v2362_v46, 0.0  ;;  %v3296_v29 = vpop.f32.mrb[0].mxu1 }
 0x42e   : > { %v2394_v27 = vpack.c.bf16 %v2380_v33, %v2379_v16  ;;  %v2367_v36 = vadd.f32 %v3296_v29, %v3016_v20  ;;  %v2291_v47 = vpop.f32.mrb[1].mxu1 }
 0x42f   : > { %v2393_v41 = vpack.c.bf16 %v2378_v53, %v2377_v31  ;;  %v2365_v9 = vadd.f32 %v3016_v20, %v2291_v47  ;;  %v3297_v28 = vpop.f32.mrb[2].mxu1 }
 0x430   : > { %v2368_v38 = vadd.f32 %v3297_v28, %v3016_v20  ;;  %v2294_v7 = vpop.f32.mrb[3].mxu1  ;;  %v2383_v51 = vmax.f32 %v2367_v36, 0.0  ;;  %v3628_v28 = vld [vmem:[%s4620_s30 + $0x10] sm:$0xff]  }
 0x431   : > { %v2366_v6 = vadd.f32 %v3016_v20, %v2294_v7  ;;  %3310 = vmatprep.mubr.msk.bf16.mxu0 %vm1649_vm1, %v2393_v41  ;;  %v2381_v40 = vmax.f32 %v2365_v9, 0.0 }
 0x432   : > { %v2384_v37 = vmax.f32 %v2368_v38, 0.0  ;;  %3311 = vmatmul.mubr.msk.bf16.vlgmr.msra.gmra.mrb[24].mxu0 %vm1649_vm1, %v2394_v27  ;;  %v3627_v27 = vld [vmem:[%s4620_s30 + $0x18] sm:$0xff]   ;;  %v2549_v38 = vunpack.c.l.bf16 %v3628_v28 }
 0x433   : > { %v2382_v55 = vmax.f32 %v2366_v6, 0.0  ;;  %v2551_v36 = vunpack.c.l.bf16 %v3627_v27 }
 0x434   : > { %v2396_v32 = vpack.c.bf16 %v2384_v37, %v2383_v51  ;;  %v2552_v37 = vunpack.c.h.bf16 %v3627_v27 }
 0x435   : > { %v2395_v56 = vpack.c.bf16 %v2382_v55, %v2381_v40  ;;  %v3300_v23 = vpop.f32.mrb[4].mxu1 }
 0x436   : > { %v2371_v54 = vadd.f32 %v3300_v23, %v3016_v20  ;;  %v2307_v57 = vpop.f32.mrb[5].mxu1 }
 0x437   : > { %v2369_v12 = vadd.f32 %v3016_v20, %v2307_v57  ;;  %v3301_v60 = vpop.f32.mrb[6].mxu1  ;;  %3314 = vmatprep.mubr.msk.bf16.mxu0 %vm1649_vm1, %v2395_v56  ;;  %v2550_v56 = vunpack.c.h.bf16 %v3628_v28 }
 0x438   : > { %v2372_v61 = vadd.f32 %v3301_v60, %v3016_v20  ;;  %v2310_v50 = vpop.f32.mrb[7].mxu1  ;;  %v2387_v8 = vmax.f32 %v2371_v54, 0.0 }
 0x439   : > { %v2370_v62 = vadd.f32 %v3016_v20, %v2310_v50  ;;  %v2385_v24 = vmax.f32 %v2369_v12, 0.0 }
 0x43a   : > { %v2388_v30 = vmax.f32 %v2372_v61, 0.0  ;;  %3315 = vmatmul.mubr.msk.bf16.gmra.mrb[28].mxu0 %vm1649_vm1, %v2396_v32 }
 0x43b   : > { %v2386_v17 = vmax.f32 %v2370_v62, 0.0 }
 0x43c   : > { %v2398_v19 = vpack.c.bf16 %v2388_v30, %v2387_v8  ;;  %v3629_v30 = vld [vmem:[%s4620_s30 + $0x28] sm:$0xff]  }
 0x43d   : > { %v2397_v25 = vpack.c.bf16 %v2386_v17, %v2385_v24  ;;  %v3304_v63 = vpop.f32.mrb[8].mxu1  ;;  %v2555_v24 = vunpack.c.l.bf16 %v3629_v30 }
 0x43e   : > { %v2375_v10 = vadd.f32 %v3304_v63, %v3016_v20  ;;  %v2323_v14 = vpop.f32.mrb[9].mxu1  ;;  %v3630_v63 = vld [vmem:[%s4620_s30 + $0x20] sm:$0xff]  }
 0x43f   : > { %v2373_v3 = vadd.f32 %v3016_v20, %v2323_v14  ;;  %v3305_v2 = vpop.f32.mrb[10].mxu1  ;;  %3318 = vmatprep.mubr.msk.bf16.mxu0 %vm1649_vm1, %v2397_v25 }
 0x440   : > { %v2376_v48 = vadd.f32 %v3305_v2, %v3016_v20  ;;  %v2326_v1 = vpop.f32.mrb[11].mxu1  ;;  %v2391_v13 = vmax.f32 %v2375_v10, 0.0  ;;  %v2553_v10 = vunpack.c.l.bf16 %v3630_v63 }
 0x441   : > { %v2374_v18 = vadd.f32 %v3016_v20, %v2326_v1  ;;  %v2389_v52 = vmax.f32 %v2373_v3, 0.0 }
 0x442   : > { %v2392_v43 = vmax.f32 %v2376_v48, 0.0  ;;  %3319 = vmatmul.mubr.msk.bf16.gmra.mrb[32].mxu0 %vm1649_vm1, %v2398_v19  ;;  %v2556_v48 = vunpack.c.h.bf16 %v3629_v30 }
 0x443   : > { %v2390_v44 = vmax.f32 %v2374_v18, 0.0 }
 0x444   : > { %v2400_v45 = vpack.c.bf16 %v2392_v43, %v2391_v13  ;;  %v2554_v43 = vunpack.c.h.bf16 %v3630_v63 }
 0x445   : > { %v2399_v0 = vpack.c.bf16 %v2390_v44, %v2389_v52 }
 0x447   : > { %3322 = vmatprep.mubr.msk.bf16.mxu0 %vm1649_vm1, %v2399_v0 }
 0x44a   : > { %3323 = vmatmul.mubr.msk.bf16.gmra.mrb[36].mxu0 %vm1649_vm1, %v2400_v45 }
 0x505   : > { %v3312_v21 = vpop.f32.mrb[24].mxu0 }
 0x506   : > { %v2491_v20 = vadd.f32 %v3312_v21, %v5114_v58  ;;  %v2482_v22 = vpop.f32.mrb[25].mxu0 }
 0x507   : > { %v2483_v26 = vadd.f32 %v5114_v58, %v2482_v22  ;;  %v3313_v5 = vpop.f32.mrb[26].mxu0 }
 0x508   : > { %v2563_v39 = vadd.f32 %v2547_v35, %v2491_v20  ;;  %v2494_v42 = vadd.f32 %v3313_v5, %v5114_v58  ;;  %v2485_v11 = vpop.f32.mrb[27].mxu0  ;;  %v3631_v20 = vld [vmem:[%s4620_s30 + $0x38] sm:$0xff]  }
 0x509   : > { %v2561_v46 = vadd.f32 %v2545_v15, %v2483_v26  ;;  %v2486_v16 = vadd.f32 %v5114_v58, %v2485_v11  ;;  %v2559_v22 = vunpack.c.l.bf16 %v3631_v20 }
 0x50a   : > { %v2564_v33 = vadd.f32 %v2548_v49, %v2494_v42  ;;  %v2579_v53 = vmax.f32 %v2563_v39, 0.0 }
 0x50b   : > { %v2562_v31 = vadd.f32 %v2546_v34, %v2486_v16  ;;  %v2577_v47 = vmax.f32 %v2561_v46, 0.0  ;;  %v3632_v34 = vld [vmem:[%s4620_s30 + $0x30] sm:$0xff]   ;;  %v2560_v16 = vunpack.c.h.bf16 %v3631_v20  ;;  %s2687_s30 = sadd.s32 %s3068_s8, %s3047_s16 }
 0x50c   : > { %v2580_v29 = vmax.f32 %v2564_v33, 0.0  ;;  %v2557_v39 = vunpack.c.l.bf16 %v3632_v34  ;;  %s3048_s28 = sshll.u32 %s2687_s30, 6 }
 0x50d   : > { %v2578_v41 = vmax.f32 %v2562_v31, 0.0  ;;  %v3316_v9 = vpop.f32.mrb[28].mxu0  ;;  %s5158_s25 = scalar_lea.hbm %s5369_s3, %s3048_s28 }
 0x50e   : > { %v3077_v7 = vpack.c.bf16 %v2580_v29, %v2579_v53  ;;  %v2507_v6 = vadd.f32 %v3316_v9, %v5114_v58  ;;  %v2498_v51 = vpop.f32.mrb[29].mxu0  ;;  %v2558_v29 = vunpack.c.h.bf16 %v3632_v34 }
 0x50f   : > { %v3072_v40 = vpack.c.bf16 %v2578_v41, %v2577_v47  ;;  %v2499_v55 = vadd.f32 %v5114_v58, %v2498_v51  ;;  %v3317_v32 = vpop.f32.mrb[30].mxu0 }
 0x510   : > { %3109 = vst [vmem:[%s5128_s15 + $0x8] sm:$0xff] %v3077_v7   ;;  %v2567_v23 = vadd.f32 %v2551_v36, %v2507_v6  ;;  %v2510_v54 = vadd.f32 %v3317_v32, %v5114_v58  ;;  %v2501_v57 = vpop.f32.mrb[31].mxu0 }
 0x511   : > { %3073 = vst [vmem:[%s5128_s15] sm:$0xff] %v3072_v40   ;;  %v2565_v12 = vadd.f32 %v2549_v38, %v2499_v55  ;;  %v2502_v60 = vadd.f32 %v5114_v58, %v2501_v57 }
 0x512   : > { %v2568_v61 = vadd.f32 %v2552_v37, %v2510_v54  ;;  %v2583_v62 = vmax.f32 %v2567_v23, 0.0 }
 0x513   : > { %v2566_v50 = vadd.f32 %v2550_v56, %v2502_v60  ;;  %v2581_v17 = vmax.f32 %v2565_v12, 0.0 }
 0x514   : > { %v2584_v8 = vmax.f32 %v2568_v61, 0.0 }
 0x515   : > { %v2582_v19 = vmax.f32 %v2566_v50, 0.0  ;;  %v3320_v25 = vpop.f32.mrb[32].mxu0 }
 0x516   : > { %v3087_v14 = vpack.c.bf16 %v2584_v8, %v2583_v62  ;;  %v2523_v3 = vadd.f32 %v3320_v25, %v5114_v58  ;;  %v2514_v2 = vpop.f32.mrb[33].mxu0 }
 0x517   : > { %v3082_v1 = vpack.c.bf16 %v2582_v19, %v2581_v17  ;;  %v2515_v18 = vadd.f32 %v5114_v58, %v2514_v2  ;;  %v3321_v13 = vpop.f32.mrb[34].mxu0 }
 0x518   : > { %3111 = vst [vmem:[%s5128_s15 + $0x18] sm:$0xff] %v3087_v14   ;;  %v2571_v52 = vadd.f32 %v2555_v24, %v2523_v3  ;;  %v2526_v44 = vadd.f32 %v3321_v13, %v5114_v58  ;;  %v2517_v45 = vpop.f32.mrb[35].mxu0 }
 0x519   : > { %3110 = vst [vmem:[%s5128_s15 + $0x10] sm:$0xff] %v3082_v1   ;;  %v2569_v0 = vadd.f32 %v2553_v10, %v2515_v18  ;;  %v2518_v4 = vadd.f32 %v5114_v58, %v2517_v45 }
 0x51a   : > { %v2572_v35 = vadd.f32 %v2556_v48, %v2526_v44  ;;  %v2587_v59 = vmax.f32 %v2571_v52, 0.0 }
 0x51b   : > { %v2570_v21 = vadd.f32 %v2554_v43, %v2518_v4  ;;  %v2585_v49 = vmax.f32 %v2569_v0, 0.0 }
 0x51c   : > { %v2588_v15 = vmax.f32 %v2572_v35, 0.0 }
 0x51d   : > { %v2586_v26 = vmax.f32 %v2570_v21, 0.0  ;;  %v3324_v5 = vpop.f32.mrb[36].mxu0 }
 0x51e   : > { %v3097_v42 = vpack.c.bf16 %v2588_v15, %v2587_v59  ;;  %v2539_v11 = vadd.f32 %v3324_v5, %v5114_v58  ;;  %v2530_v46 = vpop.f32.mrb[37].mxu0 }
 0x51f   : > { %v3092_v33 = vpack.c.bf16 %v2586_v26, %v2585_v49  ;;  %v2531_v31 = vadd.f32 %v5114_v58, %v2530_v46  ;;  %v3325_v53 = vpop.f32.mrb[38].mxu0 }
 0x520   : > { %3113 = vst [vmem:[%s5128_s15 + $0x28] sm:$0xff] %v3097_v42   ;;  %v2575_v27 = vadd.f32 %v2559_v22, %v2539_v11  ;;  %v2542_v36 = vadd.f32 %v3325_v53, %v5114_v58  ;;  %v2533_v47 = vpop.f32.mrb[39].mxu0 }
 0x521   : > { %3112 = vst [vmem:[%s5128_s15 + $0x20] sm:$0xff] %v3092_v33   ;;  %v2573_v41 = vadd.f32 %v2557_v39, %v2531_v31  ;;  %v2534_v9 = vadd.f32 %v5114_v58, %v2533_v47 }
 0x522   : > { %v2576_v28 = vadd.f32 %v2560_v16, %v2542_v36  ;;  %v2591_v7 = vmax.f32 %v2575_v27, 0.0 }
 0x523   : > { %v2574_v38 = vadd.f32 %v2558_v29, %v2534_v9  ;;  %v2589_v51 = vmax.f32 %v2573_v41, 0.0 }
 0x524   : > { %v2592_v6 = vmax.f32 %v2576_v28, 0.0 }
 0x525   : > { %v2590_v37 = vmax.f32 %v2574_v38, 0.0 }
 0x526   : > { %v3107_v40 = vpack.c.bf16 %v2592_v6, %v2591_v7 }
 0x527   : > { %v3102_v55 = vpack.c.bf16 %v2590_v37, %v2589_v51 }
 0x528   : > { %3115 = vst [vmem:[%s5128_s15 + $0x38] sm:$0xff] %v3107_v40  }
 0x529   : > { %3114 = vst [vmem:[%s5128_s15 + $0x30] sm:$0xff] %v3102_v55  }
 0x52a   : > { %3904 = shalt.err (!%p3901_p2)
}
 0x52b   : > { %s3905_s10 = scalar_lea.hbm %s5158_s25, 1024  ;;  %s3909_s19 = scalar_lea.hbm %s5369_s3, 4096 }
 0x52c   : > { %p3906_p6 = scmp.ne.s32.totalorder %s5158_s25, %s3905_s10  ;;  %p3910_p3 = scmp.lt.u32.totalorder %s5158_s25, %s5369_s3 }
 0x52d   : > { %p3911_p9 = scmp.lt.u32.totalorder %s3909_s19, %s3905_s10  ;;  %p3913_p7 = scmp.lt.u32.totalorder %s3905_s10, %s5158_s25 }
 0x52e   : > { %p3907_p8 = pnand %p3906_p6, %p5370_p12 }
 0x52f   : > { %p3912_p11 = por %p3911_p9, %p3910_p3 }
 0x530   : > { %p3908_p4 = pneg %p3907_p8 }
 0x531   : > { %p3914_p13 = por %p3913_p7, %p3912_p11 }
 0x533   : > { %p3915_p1 = pnand %p3914_p13, %p3908_p4 }
 0x535   : > { %3918 = shalt.err (!%p3915_p1)
}
 0x536   : > { %s4075_s30 = smov 4  }
 0x537   : > { %3400 = dma.vmem_to_hbm [thread:$0]  (%p5370_p12), %s5153_s13, 1024, %s5158_s25, %s2674_s18, %s4072_s24, %s4072_s24, %s4075_s30  }
 0x538 PF: > { %s5371_s28 = sld [smem:[#allocation29_spill]]  ;;  %p3448_p5 = scmp.ge.s32.totalorder %s4057_s22, 2 }
 0x539   : > { %p5372_p10 = scmp.ne.s32.totalorder %s5326_s11, 0 }
 0x53b   : > { %p3432_p0 = pnand %p3448_p5, %p5372_p10 }
 0x53e   : > { %s2705_s27 = sand.u32 1, %s5371_s28  }
 0x53f   : > { %s2706_s1 = scalar_lea.sflag [#allocation4], %s2705_s27 }
 0x540   : > { %4000 = dma.done.wait (!%p3432_p0), %s2706_s1, 1024  }
 0x541   : > { %4002 = vsyncadd (!%p3432_p0), %s2706_s1, 4294966272  ;;  %s31_s22 = sadd.s32 1, %s4057_s22   ;;  %s5374_s30 = sld [smem:[#allocation26_spill]] }
 0x542   : > { %p5193_p2 = scmp.ge.s32.totalorder %s31_s22, 6   ;;  %s5375_s10 = sld [smem:[#allocation27_spill]] }
 0x543   : > { %s5376_s12 = sld [smem:[#allocation28_spill]]  ;;  %s5377_s15 = sld [smem:[#allocation30_spill]] }
 0x544   : > { %s5378_s6 = sld [smem:[#allocation34_spill]]  ;;  %s5379_s24 = sld [smem:[#allocation35_spill]] }
 0x545   : > { %s5380_s11 = smov %s5404_s26  ;;  %s5381_s13 = smov %s4025_s14 }
 0x546   : > { %s5382_s14 = smov %s4342_s5  ;;  %s5383_s16 = smov %s4037_s17 }
 0x547   : > { %s5384_s17 = smov %s4462_s7  ;;  %s5385_s18 = smov %s4049_s20 }
 0x548   : > { %s5386_s19 = smov %s4053_s21  ;;  %30 = sbr.rel (!%p5193_p2) target bundleno = 26 (0x1a), region = 151 }
 0x54a   : > { %s5387_s20 = smov %s5378_s6  ;;  %s5388_s21 = smov %s5379_s24 }
 0x54f   :  { %2711 = vsyncpa [#allocation3], 1 }
 0x550   :  { %2713 = vsyncpa [#allocation3 + $0x1], 1 }
 0x551   :  { %2714 = vsyncpa [#allocation6], 1 }
 0x552   :  { %2716 = vsyncpa [#allocation6 + $0x1], 1 }
 0x553   :  { %2717 = vsyncpa [#allocation9], 1 }
 0x554   :  { %2718 = vsyncpa [#allocation12], 1 }
 0x555   :  { %2719 = vsyncpa [#allocation15], 1 }
 0x556   :  { %2720 = vsyncpa [#allocation4], 1 }
 0x557   :  { %2722 = vsyncpa [#allocation4 + $0x1], 1 }

</bundles_post_ra>
